<compile_context>
chip_gen: v6e
topology: v6e:2x2x1
jax: 0.10.0
libtpu: 0.0.40
codegen_flags: <defaults>
</compile_context>

<pallas_src>
import jax
import jax.numpy as jnp
from jax.experimental import pallas as pl
from jax.experimental.pallas import tpu as pltpu

F32 = jnp.float32
BF16 = jnp.bfloat16


def _round_up(x, m):
    return ((x + m - 1) // m) * m


def _vmem_capacity_bytes():
    """Per-TensorCore VMEM capacity; conservative 64 MiB (v7x) fallback."""
    try:
        info = pltpu.get_tpu_info()
        cap = int(getattr(info, "vmem_capacity_bytes", 0))
        if cap > 0:
            return cap
    except Exception:
        pass
    return 64 * 1024 * 1024


def _tensorcores_per_device():
    """2 for megacore-style parts (v3/v4/v5p/v7x), 1 for v5e/v6e."""
    try:
        kind = jax.devices()[0].device_kind.lower()
    except Exception:
        return 1
    if any(tag in kind for tag in ("v7", "v5p", "v4", "v3")):
        return 2
    return 1


def _sigmoid1(x):
    # Exact sigmoid via a single EUP op: sigmoid(x) = 0.5 * tanh(x/2) + 0.5.
    return 0.5 * jnp.tanh(0.5 * x) + 0.5


def _make_lstm_kernel(T, T_BLK, Hp):
    """Recurrent LSTM core. Grid = (batch_chunks, time_blocks).

    gx_ref:   (T_BLK, bB, 4*Hp) bf16  precomputed x-projection + biases
    w_hh_ref: (Hp, 4*Hp)        bf16  hidden->gates weight (pre-transposed)
    hseq_ref: (T_BLK, bB, Hp)   bf16  per-timestep hidden states (fed to FC)
    h_out_ref/c_out_ref: (bB, Hp) f32 final state (written on last time block)
    h_scr/c_scr: (bB, Hp) f32 scratch carrying state across time blocks
    """
    need_mask = (T % T_BLK) != 0

    def kernel(gx_ref, w_hh_ref, hseq_ref, h_out_ref, c_out_ref, h_scr, c_scr):
        ti = pl.program_id(1)

        @pl.when(ti == 0)
        def _():
            h_scr[...] = jnp.zeros_like(h_scr)
            c_scr[...] = jnp.zeros_like(c_scr)

        # Per-gate bf16 weight tiles, loaded once per time block (lane-aligned
        # static slices of the resident (Hp, 4*Hp) block).
        w_i = w_hh_ref[:, 0 * Hp:1 * Hp]
        w_f = w_hh_ref[:, 1 * Hp:2 * Hp]
        w_g = w_hh_ref[:, 2 * Hp:3 * Hp]
        w_o = w_hh_ref[:, 3 * Hp:4 * Hp]

        h = h_scr[...]          # (bB, Hp) f32
        c = c_scr[...]

        # Statically unrolled time block (T_BLK <= 32).  Only the recurrent
        # per-gate matmuls + nonlinearities sit on this serial path.
        for k in range(T_BLK):
            h_b = h.astype(BF16)
            gx_k = gx_ref[k]                      # (bB, 4*Hp) bf16

            pre_i = gx_k[:, 0 * Hp:1 * Hp].astype(F32) + jnp.dot(
                h_b, w_i, preferred_element_type=F32)
            i_g = _sigmoid1(pre_i)
            pre_f = gx_k[:, 1 * Hp:2 * Hp].astype(F32) + jnp.dot(
                h_b, w_f, preferred_element_type=F32)
            f_g = _sigmoid1(pre_f)
            pre_g = gx_k[:, 2 * Hp:3 * Hp].astype(F32) + jnp.dot(
                h_b, w_g, preferred_element_type=F32)
            g_g = jnp.tanh(pre_g)
            pre_o = gx_k[:, 3 * Hp:4 * Hp].astype(F32) + jnp.dot(
                h_b, w_o, preferred_element_type=F32)
            o_g = _sigmoid1(pre_o)

            c_new = f_g * c + i_g * g_g
            h_new = o_g * jnp.tanh(c_new)
            if need_mask:
                # Zero-padded tail timesteps: carry old state through.
                valid = (ti * T_BLK + k) < T
                h_new = jnp.where(valid, h_new, h)
                c_new = jnp.where(valid, c_new, c)
            h, c = h_new, c_new
            hseq_ref[k] = h.astype(hseq_ref.dtype)

        h_scr[...] = h
        c_scr[...] = c

        # Final h_n / c_n: only store on the last time block.
        @pl.when(ti == pl.num_programs(1) - 1)
        def _():
            h_out_ref[...] = h
            c_out_ref[...] = c

    return kernel


def decoder_forward(inputs, params):
    """inputs: (B, T) int32 token ids. Returns (output (B,T,O), (h_n, c_n))."""
    emb = params["embedding"]          # (V, H)
    w_ih = params["w_ih"]              # (4H, H)
    w_hh = params["w_hh"]              # (4H, H)
    b_ih = params["b_ih"]              # (4H,)
    b_hh = params["b_hh"]              # (4H,)
    w_fc = params["w_fc"]              # (O, H)
    b_fc = params["b_fc"]              # (O,)

    B, T = inputs.shape
    H = emb.shape[1]
    assert T >= 1, "zero-length sequences are not supported"

    # ---- Hoisted, non-recurrent work (XLA) --------------------------------
    # Embedding gather directly into time-major layout, then one big input
    # projection (M = T*B rows) with both biases folded in.  Default TPU
    # matmul precision (bf16 passes) is used; exact f32 PyTorch parity would
    # need precision=HIGHEST here.
    x_tm = jnp.take(emb, inputs.T, axis=0)                 # (T, B, H)
    gx = jnp.dot(x_tm, w_ih.T) + (b_ih + b_hh)             # (T, B, 4H) f32

    # ---- Padding / tiling choices ------------------------------------------
    Hp = _round_up(H, 128)                  # lane-aligned hidden size
    if _tensorcores_per_device() >= 2 and B >= 32:
        n_bchunks = 2                       # megacore split (each chunk >=16 rows)
        bB = _round_up(-(-B // 2), 8)
    else:
        n_bchunks = 1                       # single-TC: splitting only adds steps
        bB = _round_up(B, 8)
    Bp = n_bchunks * bB

    # Size the time block against this generation's VMEM.
    cap = _vmem_capacity_bytes()
    budget = int(0.60 * cap)
    bytes_fixed = (
        2 * (Hp * 4 * Hp) * 2        # W_hh bf16, double-buffered
        + 2 * 2 * bB * Hp * 4        # h_n / c_n f32, double-buffered
        + 2 * bB * Hp * 4            # h / c scratch f32
    )
    bytes_per_t = (
        2 * bB * 4 * Hp * 2          # gx block bf16, double-buffered
        + 2 * bB * Hp * 2            # h_seq block bf16, double-buffered
    )
    t_cap = int(max(1, (budget - bytes_fixed) // bytes_per_t))
    t_cap = min(t_cap, 32, T)
    # Prefer a T_BLK that divides T (drops per-step masking and time padding);
    # otherwise use the cap and mask the tail.
    T_BLK = 1
    for d in range(1, t_cap + 1):
        if T % d == 0:
            T_BLK = d
    if T_BLK < max(1, t_cap // 2):
        T_BLK = t_cap
    T_pad = _round_up(T, T_BLK)
    n_tblk = T_pad // T_BLK

    # Pad per-gate so every gate slice stays 128-lane aligned:
    # (T, B, 4, H) -> (T_pad, Bp, 4, Hp) -> (T_pad, Bp, 4*Hp), stored bf16.
    gx_p = jnp.pad(
        gx.reshape(T, B, 4, H),
        ((0, T_pad - T), (0, Bp - B), (0, 0), (0, Hp - H)),
    ).reshape(T_pad, Bp, 4 * Hp).astype(BF16)

    # W_hh^T padded the same way; zero rows/cols keep padded hidden units
    # exactly 0 through the recurrence.  Stored bf16 for the MXU.
    w_hh_p = jnp.pad(
        w_hh.T.reshape(H, 4, H),
        ((0, Hp - H), (0, 0), (0, Hp - H)),
    ).reshape(Hp, 4 * Hp).astype(BF16)

    # ---- Recurrent Pallas kernel -------------------------------------------
    grid_spec = pltpu.PrefetchScalarGridSpec(
        num_scalar_prefetch=0,
        grid=(n_bchunks, n_tblk),
        in_specs=[
            pl.BlockSpec((T_BLK, bB, 4 * Hp), lambda bi, ti: (ti, bi, 0)),  # gx
            pl.BlockSpec((Hp, 4 * Hp), lambda bi, ti: (0, 0)),              # W_hh^T
        ],
        out_specs=[
            pl.BlockSpec((T_BLK, bB, Hp), lambda bi, ti: (ti, bi, 0)),      # h_seq
            pl.BlockSpec((bB, Hp), lambda bi, ti: (bi, 0)),                 # h_n
            pl.BlockSpec((bB, Hp), lambda bi, ti: (bi, 0)),                 # c_n
        ],
        scratch_shapes=[
            pltpu.VMEM((bB, Hp), F32),   # h carry
            pltpu.VMEM((bB, Hp), F32),   # c carry
        ],
    )

    vmem_needed = bytes_fixed + T_BLK * bytes_per_t
    vmem_limit = int(min(max(2 * vmem_needed, 32 * 1024 * 1024),
                         int(0.85 * cap)))

    hseq_p, h_n_p, c_n_p = pl.pallas_call(
        _make_lstm_kernel(T, T_BLK, Hp),
        out_shape=(
            jax.ShapeDtypeStruct((T_pad, Bp, Hp), BF16),
            jax.ShapeDtypeStruct((Bp, Hp), F32),
            jax.ShapeDtypeStruct((Bp, Hp), F32),
        ),
        grid_spec=grid_spec,
        compiler_params=pltpu.CompilerParams(
            dimension_semantics=("parallel", "arbitrary"),
            vmem_limit_bytes=vmem_limit),
    )(gx_p, w_hh_p)

    # ---- Hoisted output projection (XLA, M = T*B rows) ---------------------
    h_seq = hseq_p[:T, :B, :H]                                 # (T, B, H) bf16
    output = jnp.einsum("tbh,oh->bto", h_seq, w_fc.astype(BF16),
                        preferred_element_type=F32) + b_fc     # (B, T, O) f32

    # PyTorch hidden for num_layers=1: (1, B, H) each.
    h_n = h_n_p[:B, :H][None]
    c_n = c_n_p[:B, :H][None]
    return output, (h_n, c_n)


def init_params(key, num_vocabs, hidden_size, output_size):
    ks = jax.random.split(key, 7)
    s = 0.1
    return {
        "embedding": s * jax.random.normal(ks[0], (num_vocabs, hidden_size), jnp.float32),
        "w_ih": s * jax.random.normal(ks[1], (4 * hidden_size, hidden_size), jnp.float32),
        "w_hh": s * jax.random.normal(ks[2], (4 * hidden_size, hidden_size), jnp.float32),
        "b_ih": s * jax.random.normal(ks[3], (4 * hidden_size,), jnp.float32),
        "b_hh": s * jax.random.normal(ks[4], (4 * hidden_size,), jnp.float32),
        "w_fc": s * jax.random.normal(ks[5], (output_size, hidden_size), jnp.float32),
        "b_fc": s * jax.random.normal(ks[6], (output_size,), jnp.float32),
    }


if __name__ == "__main__":
    # Small shapes consistent with the module's forward.
    num_vocabs = 16
    hidden_size = 32
    output_size = 64
    B, T = 2, 8

    key = jax.random.PRNGKey(0)
    pkey, ikey = jax.random.split(key)
    params = init_params(pkey, num_vocabs, hidden_size, output_size)

    inputs = jax.random.randint(ikey, (B, T), 0, num_vocabs, dtype=jnp.int32)

    output, (h_n, c_n) = decoder_forward(inputs, params)
    jax.block_until_ready((output, h_n, c_n))

    assert output.shape == (B, T, output_size)
    assert h_n.shape == (1, B, hidden_size)
    assert c_n.shape == (1, B, hidden_size)
    print("KERNEL_OK")
</pallas_src>

<mosaic_0001>
module attributes {stable_mosaic.version = 11 : i64} {
  func.func @kernel(%arg0: i32, %arg1: i32, %arg2: memref<8x8x512xbf16, #tpu.memory_space<vmem>>, %arg3: memref<128x512xbf16, #tpu.memory_space<vmem>>, %arg4: memref<8x8x128xbf16, #tpu.memory_space<vmem>>, %arg5: memref<8x128xf32, #tpu.memory_space<vmem>>, %arg6: memref<8x128xf32, #tpu.memory_space<vmem>>, %arg7: memref<8x128xf32, #tpu.memory_space<vmem>>, %arg8: memref<8x128xf32, #tpu.memory_space<vmem>>) attributes {dimension_semantics = [#tpu.dimension_semantics<parallel>, #tpu.dimension_semantics<arbitrary>], iteration_bounds = array<i64: 1, 1>, scalar_prefetch = 0 : i64, scratch_operands = 2 : i64, tpu.core_type = #tpu.core_type<tc>, window_params = [{transform_indices = @transform_0, window_bounds = array<i64: 8, 8, 512>}, {pipeline_mode = #tpu.pipeline_mode<synchronous>, transform_indices = @transform_1, window_bounds = array<i64: 128, 512>}, {transform_indices = @transform_2, window_bounds = array<i64: 8, 8, 128>}, {transform_indices = @transform_3, window_bounds = array<i64: 8, 128>}, {transform_indices = @transform_4, window_bounds = array<i64: 8, 128>}]} {
    %c0_i32 = arith.constant 0 : i32
    %0 = arith.cmpi eq, %arg1, %c0_i32 : i32
    %1 = arith.extui %0 : i1 to i32
    %c0_i32_0 = arith.constant 0 : i32
    %2 = arith.cmpi ne, %1, %c0_i32_0 : i32
    scf.if %2 {
      %cst_159 = arith.constant 0.000000e+00 : f32
      %414 = vector.broadcast %cst_159 : f32 to vector<8x128xf32>
      %c0_160 = arith.constant 0 : index
      %c0_161 = arith.constant 0 : index
      %415 = vector.load %arg7[%c0_160, %c0_161] : memref<8x128xf32, #tpu.memory_space<vmem>>, vector<8x128xf32>
      tpu.vector_store %arg7[%c0_160, %c0_161], %414 {strides = array<i32>} : memref<8x128xf32, #tpu.memory_space<vmem>>, vector<8x128xf32>,
      %cst_162 = arith.constant 0.000000e+00 : f32
      %416 = vector.broadcast %cst_162 : f32 to vector<8x128xf32>
      %c0_163 = arith.constant 0 : index
      %c0_164 = arith.constant 0 : index
      %417 = vector.load %arg8[%c0_163, %c0_164] : memref<8x128xf32, #tpu.memory_space<vmem>>, vector<8x128xf32>
      tpu.vector_store %arg8[%c0_163, %c0_164], %416 {strides = array<i32>} : memref<8x128xf32, #tpu.memory_space<vmem>>, vector<8x128xf32>,
    } else {
    }
    %c0 = arith.constant 0 : index
    %c0_1 = arith.constant 0 : index
    %3 = vector.load %arg3[%c0, %c0_1] : memref<128x512xbf16, #tpu.memory_space<vmem>>, vector<128x128xbf16>
    %c0_2 = arith.constant 0 : index
    %c128 = arith.constant 128 : index
    %4 = vector.load %arg3[%c0_2, %c128] : memref<128x512xbf16, #tpu.memory_space<vmem>>, vector<128x128xbf16>
    %c0_3 = arith.constant 0 : index
    %c256 = arith.constant 256 : index
    %5 = vector.load %arg3[%c0_3, %c256] : memref<128x512xbf16, #tpu.memory_space<vmem>>, vector<128x128xbf16>
    %c0_4 = arith.constant 0 : index
    %c384 = arith.constant 384 : index
    %6 = vector.load %arg3[%c0_4, %c384] : memref<128x512xbf16, #tpu.memory_space<vmem>>, vector<128x128xbf16>
    %c0_5 = arith.constant 0 : index
    %c0_6 = arith.constant 0 : index
    %7 = vector.load %arg7[%c0_5, %c0_6] : memref<8x128xf32, #tpu.memory_space<vmem>>, vector<8x128xf32>
    %c0_7 = arith.constant 0 : index
    %c0_8 = arith.constant 0 : index
    %8 = vector.load %arg8[%c0_7, %c0_8] : memref<8x128xf32, #tpu.memory_space<vmem>>, vector<8x128xf32>
    %9 = arith.truncf %7 : vector<8x128xf32> to vector<8x128xbf16>
    %c0_9 = arith.constant 0 : index
    %c0_10 = arith.constant 0 : index
    %c0_11 = arith.constant 0 : index
    %10 = vector.load %arg2[%c0_9, %c0_10, %c0_11] : memref<8x8x512xbf16, #tpu.memory_space<vmem>>, vector<1x8x512xbf16>
    %11 = vector.shape_cast %10 : vector<1x8x512xbf16> to vector<8x512xbf16>
    %12 = vector.extract_strided_slice %11 {offsets = [0, 0], sizes = [8, 128], strides = [1, 1]} : vector<8x512xbf16> to vector<8x128xbf16>
    %13 = arith.extf %12 : vector<8x128xbf16> to vector<8x128xf32>
    %cst = arith.constant dense<0.000000e+00> : vector<8x128xf32>
    %14 = tpu.matmul %9, %3, %cst {dimension_numbers = #tpu.dot_dimension_numbers<[1], [0], [0], [1], [0, 0, 1, 1], [], []>} : vector<8x128xbf16>, vector<128x128xbf16>, vector<8x128xf32> -> vector<8x128xf32>
    %15 = arith.addf %13, %14 : vector<8x128xf32>
    %cst_12 = arith.constant 5.000000e-01 : f32
    %16 = vector.broadcast %cst_12 : f32 to vector<8x128xf32>
    %17 = arith.mulf %16, %15 : vector<8x128xf32>
    %18 = math.tanh %17 : vector<8x128xf32>
    %cst_13 = arith.constant 5.000000e-01 : f32
    %19 = vector.broadcast %cst_13 : f32 to vector<8x128xf32>
    %20 = arith.mulf %19, %18 : vector<8x128xf32>
    %cst_14 = arith.constant 5.000000e-01 : f32
    %21 = vector.broadcast %cst_14 : f32 to vector<8x128xf32>
    %22 = arith.addf %20, %21 : vector<8x128xf32>
    %23 = vector.extract_strided_slice %11 {offsets = [0, 128], sizes = [8, 128], strides = [1, 1]} : vector<8x512xbf16> to vector<8x128xbf16>
    %24 = arith.extf %23 : vector<8x128xbf16> to vector<8x128xf32>
    %cst_15 = arith.constant dense<0.000000e+00> : vector<8x128xf32>
    %25 = tpu.matmul %9, %4, %cst_15 {dimension_numbers = #tpu.dot_dimension_numbers<[1], [0], [0], [1], [0, 0, 1, 1], [], []>} : vector<8x128xbf16>, vector<128x128xbf16>, vector<8x128xf32> -> vector<8x128xf32>
    %26 = arith.addf %24, %25 : vector<8x128xf32>
    %cst_16 = arith.constant 5.000000e-01 : f32
    %27 = vector.broadcast %cst_16 : f32 to vector<8x128xf32>
    %28 = arith.mulf %27, %26 : vector<8x128xf32>
    %29 = math.tanh %28 : vector<8x128xf32>
    %cst_17 = arith.constant 5.000000e-01 : f32
    %30 = vector.broadcast %cst_17 : f32 to vector<8x128xf32>
    %31 = arith.mulf %30, %29 : vector<8x128xf32>
    %cst_18 = arith.constant 5.000000e-01 : f32
    %32 = vector.broadcast %cst_18 : f32 to vector<8x128xf32>
    %33 = arith.addf %31, %32 : vector<8x128xf32>
    %34 = vector.extract_strided_slice %11 {offsets = [0, 256], sizes = [8, 128], strides = [1, 1]} : vector<8x512xbf16> to vector<8x128xbf16>
    %35 = arith.extf %34 : vector<8x128xbf16> to vector<8x128xf32>
    %cst_19 = arith.constant dense<0.000000e+00> : vector<8x128xf32>
    %36 = tpu.matmul %9, %5, %cst_19 {dimension_numbers = #tpu.dot_dimension_numbers<[1], [0], [0], [1], [0, 0, 1, 1], [], []>} : vector<8x128xbf16>, vector<128x128xbf16>, vector<8x128xf32> -> vector<8x128xf32>
    %37 = arith.addf %35, %36 : vector<8x128xf32>
    %38 = math.tanh %37 : vector<8x128xf32>
    %39 = vector.extract_strided_slice %11 {offsets = [0, 384], sizes = [8, 128], strides = [1, 1]} : vector<8x512xbf16> to vector<8x128xbf16>
    %40 = arith.extf %39 : vector<8x128xbf16> to vector<8x128xf32>
    %cst_20 = arith.constant dense<0.000000e+00> : vector<8x128xf32>
    %41 = tpu.matmul %9, %6, %cst_20 {dimension_numbers = #tpu.dot_dimension_numbers<[1], [0], [0], [1], [0, 0, 1, 1], [], []>} : vector<8x128xbf16>, vector<128x128xbf16>, vector<8x128xf32> -> vector<8x128xf32>
    %42 = arith.addf %40, %41 : vector<8x128xf32>
    %cst_21 = arith.constant 5.000000e-01 : f32
    %43 = vector.broadcast %cst_21 : f32 to vector<8x128xf32>
    %44 = arith.mulf %43, %42 : vector<8x128xf32>
    %45 = math.tanh %44 : vector<8x128xf32>
    %cst_22 = arith.constant 5.000000e-01 : f32
    %46 = vector.broadcast %cst_22 : f32 to vector<8x128xf32>
    %47 = arith.mulf %46, %45 : vector<8x128xf32>
    %cst_23 = arith.constant 5.000000e-01 : f32
    %48 = vector.broadcast %cst_23 : f32 to vector<8x128xf32>
    %49 = arith.addf %47, %48 : vector<8x128xf32>
    %50 = arith.mulf %33, %8 : vector<8x128xf32>
    %51 = arith.mulf %22, %38 : vector<8x128xf32>
    %52 = arith.addf %50, %51 : vector<8x128xf32>
    %53 = math.tanh %52 : vector<8x128xf32>
    %54 = arith.mulf %49, %53 : vector<8x128xf32>
    %55 = arith.truncf %54 : vector<8x128xf32> to vector<8x128xbf16>
    %c0_24 = arith.constant 0 : index
    %c0_25 = arith.constant 0 : index
    %c0_26 = arith.constant 0 : index
    %56 = vector.load %arg4[%c0_24, %c0_25, %c0_26] : memref<8x8x128xbf16, #tpu.memory_space<vmem>>, vector<1x8x128xbf16>
    %57 = vector.shape_cast %56 : vector<1x8x128xbf16> to vector<8x128xbf16>
    %58 = vector.shape_cast %55 : vector<8x128xbf16> to vector<1x8x128xbf16>
    tpu.vector_store %arg4[%c0_24, %c0_25, %c0_26], %58 {strides = array<i32>} : memref<8x8x128xbf16, #tpu.memory_space<vmem>>, vector<1x8x128xbf16>,
    %59 = arith.truncf %54 : vector<8x128xf32> to vector<8x128xbf16>
    %c1 = arith.constant 1 : index
    %c0_27 = arith.constant 0 : index
    %c0_28 = arith.constant 0 : index
    %60 = vector.load %arg2[%c1, %c0_27, %c0_28] : memref<8x8x512xbf16, #tpu.memory_space<vmem>>, vector<1x8x512xbf16>
    %61 = vector.shape_cast %60 : vector<1x8x512xbf16> to vector<8x512xbf16>
    %62 = vector.extract_strided_slice %61 {offsets = [0, 0], sizes = [8, 128], strides = [1, 1]} : vector<8x512xbf16> to vector<8x128xbf16>
    %63 = arith.extf %62 : vector<8x128xbf16> to vector<8x128xf32>
    %cst_29 = arith.constant dense<0.000000e+00> : vector<8x128xf32>
    %64 = tpu.matmul %59, %3, %cst_29 {dimension_numbers = #tpu.dot_dimension_numbers<[1], [0], [0], [1], [0, 0, 1, 1], [], []>} : vector<8x128xbf16>, vector<128x128xbf16>, vector<8x128xf32> -> vector<8x128xf32>
    %65 = arith.addf %63, %64 : vector<8x128xf32>
    %cst_30 = arith.constant 5.000000e-01 : f32
    %66 = vector.broadcast %cst_30 : f32 to vector<8x128xf32>
    %67 = arith.mulf %66, %65 : vector<8x128xf32>
    %68 = math.tanh %67 : vector<8x128xf32>
    %cst_31 = arith.constant 5.000000e-01 : f32
    %69 = vector.broadcast %cst_31 : f32 to vector<8x128xf32>
    %70 = arith.mulf %69, %68 : vector<8x128xf32>
    %cst_32 = arith.constant 5.000000e-01 : f32
    %71 = vector.broadcast %cst_32 : f32 to vector<8x128xf32>
    %72 = arith.addf %70, %71 : vector<8x128xf32>
    %73 = vector.extract_strided_slice %61 {offsets = [0, 128], sizes = [8, 128], strides = [1, 1]} : vector<8x512xbf16> to vector<8x128xbf16>
    %74 = arith.extf %73 : vector<8x128xbf16> to vector<8x128xf32>
    %cst_33 = arith.constant dense<0.000000e+00> : vector<8x128xf32>
    %75 = tpu.matmul %59, %4, %cst_33 {dimension_numbers = #tpu.dot_dimension_numbers<[1], [0], [0], [1], [0, 0, 1, 1], [], []>} : vector<8x128xbf16>, vector<128x128xbf16>, vector<8x128xf32> -> vector<8x128xf32>
    %76 = arith.addf %74, %75 : vector<8x128xf32>
    %cst_34 = arith.constant 5.000000e-01 : f32
    %77 = vector.broadcast %cst_34 : f32 to vector<8x128xf32>
    %78 = arith.mulf %77, %76 : vector<8x128xf32>
    %79 = math.tanh %78 : vector<8x128xf32>
    %cst_35 = arith.constant 5.000000e-01 : f32
    %80 = vector.broadcast %cst_35 : f32 to vector<8x128xf32>
    %81 = arith.mulf %80, %79 : vector<8x128xf32>
    %cst_36 = arith.constant 5.000000e-01 : f32
    %82 = vector.broadcast %cst_36 : f32 to vector<8x128xf32>
    %83 = arith.addf %81, %82 : vector<8x128xf32>
    %84 = vector.extract_strided_slice %61 {offsets = [0, 256], sizes = [8, 128], strides = [1, 1]} : vector<8x512xbf16> to vector<8x128xbf16>
    %85 = arith.extf %84 : vector<8x128xbf16> to vector<8x128xf32>
    %cst_37 = arith.constant dense<0.000000e+00> : vector<8x128xf32>
    %86 = tpu.matmul %59, %5, %cst_37 {dimension_numbers = #tpu.dot_dimension_numbers<[1], [0], [0], [1], [0, 0, 1, 1], [], []>} : vector<8x128xbf16>, vector<128x128xbf16>, vector<8x128xf32> -> vector<8x128xf32>
    %87 = arith.addf %85, %86 : vector<8x128xf32>
    %88 = math.tanh %87 : vector<8x128xf32>
    %89 = vector.extract_strided_slice %61 {offsets = [0, 384], sizes = [8, 128], strides = [1, 1]} : vector<8x512xbf16> to vector<8x128xbf16>
    %90 = arith.extf %89 : vector<8x128xbf16> to vector<8x128xf32>
    %cst_38 = arith.constant dense<0.000000e+00> : vector<8x128xf32>
    %91 = tpu.matmul %59, %6, %cst_38 {dimension_numbers = #tpu.dot_dimension_numbers<[1], [0], [0], [1], [0, 0, 1, 1], [], []>} : vector<8x128xbf16>, vector<128x128xbf16>, vector<8x128xf32> -> vector<8x128xf32>
    %92 = arith.addf %90, %91 : vector<8x128xf32>
    %cst_39 = arith.constant 5.000000e-01 : f32
    %93 = vector.broadcast %cst_39 : f32 to vector<8x128xf32>
    %94 = arith.mulf %93, %92 : vector<8x128xf32>
    %95 = math.tanh %94 : vector<8x128xf32>
    %cst_40 = arith.constant 5.000000e-01 : f32
    %96 = vector.broadcast %cst_40 : f32 to vector<8x128xf32>
    %97 = arith.mulf %96, %95 : vector<8x128xf32>
    %cst_41 = arith.constant 5.000000e-01 : f32
    %98 = vector.broadcast %cst_41 : f32 to vector<8x128xf32>
    %99 = arith.addf %97, %98 : vector<8x128xf32>
    %100 = arith.mulf %83, %52 : vector<8x128xf32>
    %101 = arith.mulf %72, %88 : vector<8x128xf32>
    %102 = arith.addf %100, %101 : vector<8x128xf32>
    %103 = math.tanh %102 : vector<8x128xf32>
    %104 = arith.mulf %99, %103 : vector<8x128xf32>
    %105 = arith.truncf %104 : vector<8x128xf32> to vector<8x128xbf16>
    %c1_42 = arith.constant 1 : index
    %c0_43 = arith.constant 0 : index
    %c0_44 = arith.constant 0 : index
    %106 = vector.load %arg4[%c1_42, %c0_43, %c0_44] : memref<8x8x128xbf16, #tpu.memory_space<vmem>>, vector<1x8x128xbf16>
    %107 = vector.shape_cast %106 : vector<1x8x128xbf16> to vector<8x128xbf16>
    %108 = vector.shape_cast %105 : vector<8x128xbf16> to vector<1x8x128xbf16>
    tpu.vector_store %arg4[%c1_42, %c0_43, %c0_44], %108 {strides = array<i32>} : memref<8x8x128xbf16, #tpu.memory_space<vmem>>, vector<1x8x128xbf16>,
    %109 = arith.truncf %104 : vector<8x128xf32> to vector<8x128xbf16>
    %c2 = arith.constant 2 : index
    %c0_45 = arith.constant 0 : index
    %c0_46 = arith.constant 0 : index
    %110 = vector.load %arg2[%c2, %c0_45, %c0_46] : memref<8x8x512xbf16, #tpu.memory_space<vmem>>, vector<1x8x512xbf16>
    %111 = vector.shape_cast %110 : vector<1x8x512xbf16> to vector<8x512xbf16>
    %112 = vector.extract_strided_slice %111 {offsets = [0, 0], sizes = [8, 128], strides = [1, 1]} : vector<8x512xbf16> to vector<8x128xbf16>
    %113 = arith.extf %112 : vector<8x128xbf16> to vector<8x128xf32>
    %cst_47 = arith.constant dense<0.000000e+00> : vector<8x128xf32>
    %114 = tpu.matmul %109, %3, %cst_47 {dimension_numbers = #tpu.dot_dimension_numbers<[1], [0], [0], [1], [0, 0, 1, 1], [], []>} : vector<8x128xbf16>, vector<128x128xbf16>, vector<8x128xf32> -> vector<8x128xf32>
    %115 = arith.addf %113, %114 : vector<8x128xf32>
    %cst_48 = arith.constant 5.000000e-01 : f32
    %116 = vector.broadcast %cst_48 : f32 to vector<8x128xf32>
    %117 = arith.mulf %116, %115 : vector<8x128xf32>
    %118 = math.tanh %117 : vector<8x128xf32>
    %cst_49 = arith.constant 5.000000e-01 : f32
    %119 = vector.broadcast %cst_49 : f32 to vector<8x128xf32>
    %120 = arith.mulf %119, %118 : vector<8x128xf32>
    %cst_50 = arith.constant 5.000000e-01 : f32
    %121 = vector.broadcast %cst_50 : f32 to vector<8x128xf32>
    %122 = arith.addf %120, %121 : vector<8x128xf32>
    %123 = vector.extract_strided_slice %111 {offsets = [0, 128], sizes = [8, 128], strides = [1, 1]} : vector<8x512xbf16> to vector<8x128xbf16>
    %124 = arith.extf %123 : vector<8x128xbf16> to vector<8x128xf32>
    %cst_51 = arith.constant dense<0.000000e+00> : vector<8x128xf32>
    %125 = tpu.matmul %109, %4, %cst_51 {dimension_numbers = #tpu.dot_dimension_numbers<[1], [0], [0], [1], [0, 0, 1, 1], [], []>} : vector<8x128xbf16>, vector<128x128xbf16>, vector<8x128xf32> -> vector<8x128xf32>
    %126 = arith.addf %124, %125 : vector<8x128xf32>
    %cst_52 = arith.constant 5.000000e-01 : f32
    %127 = vector.broadcast %cst_52 : f32 to vector<8x128xf32>
    %128 = arith.mulf %127, %126 : vector<8x128xf32>
    %129 = math.tanh %128 : vector<8x128xf32>
    %cst_53 = arith.constant 5.000000e-01 : f32
    %130 = vector.broadcast %cst_53 : f32 to vector<8x128xf32>
    %131 = arith.mulf %130, %129 : vector<8x128xf32>
    %cst_54 = arith.constant 5.000000e-01 : f32
    %132 = vector.broadcast %cst_54 : f32 to vector<8x128xf32>
    %133 = arith.addf %131, %132 : vector<8x128xf32>
    %134 = vector.extract_strided_slice %111 {offsets = [0, 256], sizes = [8, 128], strides = [1, 1]} : vector<8x512xbf16> to vector<8x128xbf16>
    %135 = arith.extf %134 : vector<8x128xbf16> to vector<8x128xf32>
    %cst_55 = arith.constant dense<0.000000e+00> : vector<8x128xf32>
    %136 = tpu.matmul %109, %5, %cst_55 {dimension_numbers = #tpu.dot_dimension_numbers<[1], [0], [0], [1], [0, 0, 1, 1], [], []>} : vector<8x128xbf16>, vector<128x128xbf16>, vector<8x128xf32> -> vector<8x128xf32>
    %137 = arith.addf %135, %136 : vector<8x128xf32>
    %138 = math.tanh %137 : vector<8x128xf32>
    %139 = vector.extract_strided_slice %111 {offsets = [0, 384], sizes = [8, 128], strides = [1, 1]} : vector<8x512xbf16> to vector<8x128xbf16>
    %140 = arith.extf %139 : vector<8x128xbf16> to vector<8x128xf32>
    %cst_56 = arith.constant dense<0.000000e+00> : vector<8x128xf32>
    %141 = tpu.matmul %109, %6, %cst_56 {dimension_numbers = #tpu.dot_dimension_numbers<[1], [0], [0], [1], [0, 0, 1, 1], [], []>} : vector<8x128xbf16>, vector<128x128xbf16>, vector<8x128xf32> -> vector<8x128xf32>
    %142 = arith.addf %140, %141 : vector<8x128xf32>
    %cst_57 = arith.constant 5.000000e-01 : f32
    %143 = vector.broadcast %cst_57 : f32 to vector<8x128xf32>
    %144 = arith.mulf %143, %142 : vector<8x128xf32>
    %145 = math.tanh %144 : vector<8x128xf32>
    %cst_58 = arith.constant 5.000000e-01 : f32
    %146 = vector.broadcast %cst_58 : f32 to vector<8x128xf32>
    %147 = arith.mulf %146, %145 : vector<8x128xf32>
    %cst_59 = arith.constant 5.000000e-01 : f32
    %148 = vector.broadcast %cst_59 : f32 to vector<8x128xf32>
    %149 = arith.addf %147, %148 : vector<8x128xf32>
    %150 = arith.mulf %133, %102 : vector<8x128xf32>
    %151 = arith.mulf %122, %138 : vector<8x128xf32>
    %152 = arith.addf %150, %151 : vector<8x128xf32>
    %153 = math.tanh %152 : vector<8x128xf32>
    %154 = arith.mulf %149, %153 : vector<8x128xf32>
    %155 = arith.truncf %154 : vector<8x128xf32> to vector<8x128xbf16>
    %c2_60 = arith.constant 2 : index
    %c0_61 = arith.constant 0 : index
    %c0_62 = arith.constant 0 : index
    %156 = vector.load %arg4[%c2_60, %c0_61, %c0_62] : memref<8x8x128xbf16, #tpu.memory_space<vmem>>, vector<1x8x128xbf16>
    %157 = vector.shape_cast %156 : vector<1x8x128xbf16> to vector<8x128xbf16>
    %158 = vector.shape_cast %155 : vector<8x128xbf16> to vector<1x8x128xbf16>
    tpu.vector_store %arg4[%c2_60, %c0_61, %c0_62], %158 {strides = array<i32>} : memref<8x8x128xbf16, #tpu.memory_space<vmem>>, vector<1x8x128xbf16>,
    %159 = arith.truncf %154 : vector<8x128xf32> to vector<8x128xbf16>
    %c3 = arith.constant 3 : index
    %c0_63 = arith.constant 0 : index
    %c0_64 = arith.constant 0 : index
    %160 = vector.load %arg2[%c3, %c0_63, %c0_64] : memref<8x8x512xbf16, #tpu.memory_space<vmem>>, vector<1x8x512xbf16>
    %161 = vector.shape_cast %160 : vector<1x8x512xbf16> to vector<8x512xbf16>
    %162 = vector.extract_strided_slice %161 {offsets = [0, 0], sizes = [8, 128], strides = [1, 1]} : vector<8x512xbf16> to vector<8x128xbf16>
    %163 = arith.extf %162 : vector<8x128xbf16> to vector<8x128xf32>
    %cst_65 = arith.constant dense<0.000000e+00> : vector<8x128xf32>
    %164 = tpu.matmul %159, %3, %cst_65 {dimension_numbers = #tpu.dot_dimension_numbers<[1], [0], [0], [1], [0, 0, 1, 1], [], []>} : vector<8x128xbf16>, vector<128x128xbf16>, vector<8x128xf32> -> vector<8x128xf32>
    %165 = arith.addf %163, %164 : vector<8x128xf32>
    %cst_66 = arith.constant 5.000000e-01 : f32
    %166 = vector.broadcast %cst_66 : f32 to vector<8x128xf32>
    %167 = arith.mulf %166, %165 : vector<8x128xf32>
    %168 = math.tanh %167 : vector<8x128xf32>
    %cst_67 = arith.constant 5.000000e-01 : f32
    %169 = vector.broadcast %cst_67 : f32 to vector<8x128xf32>
    %170 = arith.mulf %169, %168 : vector<8x128xf32>
    %cst_68 = arith.constant 5.000000e-01 : f32
    %171 = vector.broadcast %cst_68 : f32 to vector<8x128xf32>
    %172 = arith.addf %170, %171 : vector<8x128xf32>
    %173 = vector.extract_strided_slice %161 {offsets = [0, 128], sizes = [8, 128], strides = [1, 1]} : vector<8x512xbf16> to vector<8x128xbf16>
    %174 = arith.extf %173 : vector<8x128xbf16> to vector<8x128xf32>
    %cst_69 = arith.constant dense<0.000000e+00> : vector<8x128xf32>
    %175 = tpu.matmul %159, %4, %cst_69 {dimension_numbers = #tpu.dot_dimension_numbers<[1], [0], [0], [1], [0, 0, 1, 1], [], []>} : vector<8x128xbf16>, vector<128x128xbf16>, vector<8x128xf32> -> vector<8x128xf32>
    %176 = arith.addf %174, %175 : vector<8x128xf32>
    %cst_70 = arith.constant 5.000000e-01 : f32
    %177 = vector.broadcast %cst_70 : f32 to vector<8x128xf32>
    %178 = arith.mulf %177, %176 : vector<8x128xf32>
    %179 = math.tanh %178 : vector<8x128xf32>
    %cst_71 = arith.constant 5.000000e-01 : f32
    %180 = vector.broadcast %cst_71 : f32 to vector<8x128xf32>
    %181 = arith.mulf %180, %179 : vector<8x128xf32>
    %cst_72 = arith.constant 5.000000e-01 : f32
    %182 = vector.broadcast %cst_72 : f32 to vector<8x128xf32>
    %183 = arith.addf %181, %182 : vector<8x128xf32>
    %184 = vector.extract_strided_slice %161 {offsets = [0, 256], sizes = [8, 128], strides = [1, 1]} : vector<8x512xbf16> to vector<8x128xbf16>
    %185 = arith.extf %184 : vector<8x128xbf16> to vector<8x128xf32>
    %cst_73 = arith.constant dense<0.000000e+00> : vector<8x128xf32>
    %186 = tpu.matmul %159, %5, %cst_73 {dimension_numbers = #tpu.dot_dimension_numbers<[1], [0], [0], [1], [0, 0, 1, 1], [], []>} : vector<8x128xbf16>, vector<128x128xbf16>, vector<8x128xf32> -> vector<8x128xf32>
    %187 = arith.addf %185, %186 : vector<8x128xf32>
    %188 = math.tanh %187 : vector<8x128xf32>
    %189 = vector.extract_strided_slice %161 {offsets = [0, 384], sizes = [8, 128], strides = [1, 1]} : vector<8x512xbf16> to vector<8x128xbf16>
    %190 = arith.extf %189 : vector<8x128xbf16> to vector<8x128xf32>
    %cst_74 = arith.constant dense<0.000000e+00> : vector<8x128xf32>
    %191 = tpu.matmul %159, %6, %cst_74 {dimension_numbers = #tpu.dot_dimension_numbers<[1], [0], [0], [1], [0, 0, 1, 1], [], []>} : vector<8x128xbf16>, vector<128x128xbf16>, vector<8x128xf32> -> vector<8x128xf32>
    %192 = arith.addf %190, %191 : vector<8x128xf32>
    %cst_75 = arith.constant 5.000000e-01 : f32
    %193 = vector.broadcast %cst_75 : f32 to vector<8x128xf32>
    %194 = arith.mulf %193, %192 : vector<8x128xf32>
    %195 = math.tanh %194 : vector<8x128xf32>
    %cst_76 = arith.constant 5.000000e-01 : f32
    %196 = vector.broadcast %cst_76 : f32 to vector<8x128xf32>
    %197 = arith.mulf %196, %195 : vector<8x128xf32>
    %cst_77 = arith.constant 5.000000e-01 : f32
    %198 = vector.broadcast %cst_77 : f32 to vector<8x128xf32>
    %199 = arith.addf %197, %198 : vector<8x128xf32>
    %200 = arith.mulf %183, %152 : vector<8x128xf32>
    %201 = arith.mulf %172, %188 : vector<8x128xf32>
    %202 = arith.addf %200, %201 : vector<8x128xf32>
    %203 = math.tanh %202 : vector<8x128xf32>
    %204 = arith.mulf %199, %203 : vector<8x128xf32>
    %205 = arith.truncf %204 : vector<8x128xf32> to vector<8x128xbf16>
    %c3_78 = arith.constant 3 : index
    %c0_79 = arith.constant 0 : index
    %c0_80 = arith.constant 0 : index
    %206 = vector.load %arg4[%c3_78, %c0_79, %c0_80] : memref<8x8x128xbf16, #tpu.memory_space<vmem>>, vector<1x8x128xbf16>
    %207 = vector.shape_cast %206 : vector<1x8x128xbf16> to vector<8x128xbf16>
    %208 = vector.shape_cast %205 : vector<8x128xbf16> to vector<1x8x128xbf16>
    tpu.vector_store %arg4[%c3_78, %c0_79, %c0_80], %208 {strides = array<i32>} : memref<8x8x128xbf16, #tpu.memory_space<vmem>>, vector<1x8x128xbf16>,
    %209 = arith.truncf %204 : vector<8x128xf32> to vector<8x128xbf16>
    %c4 = arith.constant 4 : index
    %c0_81 = arith.constant 0 : index
    %c0_82 = arith.constant 0 : index
    %210 = vector.load %arg2[%c4, %c0_81, %c0_82] : memref<8x8x512xbf16, #tpu.memory_space<vmem>>, vector<1x8x512xbf16>
    %211 = vector.shape_cast %210 : vector<1x8x512xbf16> to vector<8x512xbf16>
    %212 = vector.extract_strided_slice %211 {offsets = [0, 0], sizes = [8, 128], strides = [1, 1]} : vector<8x512xbf16> to vector<8x128xbf16>
    %213 = arith.extf %212 : vector<8x128xbf16> to vector<8x128xf32>
    %cst_83 = arith.constant dense<0.000000e+00> : vector<8x128xf32>
    %214 = tpu.matmul %209, %3, %cst_83 {dimension_numbers = #tpu.dot_dimension_numbers<[1], [0], [0], [1], [0, 0, 1, 1], [], []>} : vector<8x128xbf16>, vector<128x128xbf16>, vector<8x128xf32> -> vector<8x128xf32>
    %215 = arith.addf %213, %214 : vector<8x128xf32>
    %cst_84 = arith.constant 5.000000e-01 : f32
    %216 = vector.broadcast %cst_84 : f32 to vector<8x128xf32>
    %217 = arith.mulf %216, %215 : vector<8x128xf32>
    %218 = math.tanh %217 : vector<8x128xf32>
    %cst_85 = arith.constant 5.000000e-01 : f32
    %219 = vector.broadcast %cst_85 : f32 to vector<8x128xf32>
    %220 = arith.mulf %219, %218 : vector<8x128xf32>
    %cst_86 = arith.constant 5.000000e-01 : f32
    %221 = vector.broadcast %cst_86 : f32 to vector<8x128xf32>
    %222 = arith.addf %220, %221 : vector<8x128xf32>
    %223 = vector.extract_strided_slice %211 {offsets = [0, 128], sizes = [8, 128], strides = [1, 1]} : vector<8x512xbf16> to vector<8x128xbf16>
    %224 = arith.extf %223 : vector<8x128xbf16> to vector<8x128xf32>
    %cst_87 = arith.constant dense<0.000000e+00> : vector<8x128xf32>
    %225 = tpu.matmul %209, %4, %cst_87 {dimension_numbers = #tpu.dot_dimension_numbers<[1], [0], [0], [1], [0, 0, 1, 1], [], []>} : vector<8x128xbf16>, vector<128x128xbf16>, vector<8x128xf32> -> vector<8x128xf32>
    %226 = arith.addf %224, %225 : vector<8x128xf32>
    %cst_88 = arith.constant 5.000000e-01 : f32
    %227 = vector.broadcast %cst_88 : f32 to vector<8x128xf32>
    %228 = arith.mulf %227, %226 : vector<8x128xf32>
    %229 = math.tanh %228 : vector<8x128xf32>
    %cst_89 = arith.constant 5.000000e-01 : f32
    %230 = vector.broadcast %cst_89 : f32 to vector<8x128xf32>
    %231 = arith.mulf %230, %229 : vector<8x128xf32>
    %cst_90 = arith.constant 5.000000e-01 : f32
    %232 = vector.broadcast %cst_90 : f32 to vector<8x128xf32>
    %233 = arith.addf %231, %232 : vector<8x128xf32>
    %234 = vector.extract_strided_slice %211 {offsets = [0, 256], sizes = [8, 128], strides = [1, 1]} : vector<8x512xbf16> to vector<8x128xbf16>
    %235 = arith.extf %234 : vector<8x128xbf16> to vector<8x128xf32>
    %cst_91 = arith.constant dense<0.000000e+00> : vector<8x128xf32>
    %236 = tpu.matmul %209, %5, %cst_91 {dimension_numbers = #tpu.dot_dimension_numbers<[1], [0], [0], [1], [0, 0, 1, 1], [], []>} : vector<8x128xbf16>, vector<128x128xbf16>, vector<8x128xf32> -> vector<8x128xf32>
    %237 = arith.addf %235, %236 : vector<8x128xf32>
    %238 = math.tanh %237 : vector<8x128xf32>
    %239 = vector.extract_strided_slice %211 {offsets = [0, 384], sizes = [8, 128], strides = [1, 1]} : vector<8x512xbf16> to vector<8x128xbf16>
    %240 = arith.extf %239 : vector<8x128xbf16> to vector<8x128xf32>
    %cst_92 = arith.constant dense<0.000000e+00> : vector<8x128xf32>
    %241 = tpu.matmul %209, %6, %cst_92 {dimension_numbers = #tpu.dot_dimension_numbers<[1], [0], [0], [1], [0, 0, 1, 1], [], []>} : vector<8x128xbf16>, vector<128x128xbf16>, vector<8x128xf32> -> vector<8x128xf32>
    %242 = arith.addf %240, %241 : vector<8x128xf32>
    %cst_93 = arith.constant 5.000000e-01 : f32
    %243 = vector.broadcast %cst_93 : f32 to vector<8x128xf32>
    %244 = arith.mulf %243, %242 : vector<8x128xf32>
    %245 = math.tanh %244 : vector<8x128xf32>
    %cst_94 = arith.constant 5.000000e-01 : f32
    %246 = vector.broadcast %cst_94 : f32 to vector<8x128xf32>
    %247 = arith.mulf %246, %245 : vector<8x128xf32>
    %cst_95 = arith.constant 5.000000e-01 : f32
    %248 = vector.broadcast %cst_95 : f32 to vector<8x128xf32>
    %249 = arith.addf %247, %248 : vector<8x128xf32>
    %250 = arith.mulf %233, %202 : vector<8x128xf32>
    %251 = arith.mulf %222, %238 : vector<8x128xf32>
    %252 = arith.addf %250, %251 : vector<8x128xf32>
    %253 = math.tanh %252 : vector<8x128xf32>
    %254 = arith.mulf %249, %253 : vector<8x128xf32>
    %255 = arith.truncf %254 : vector<8x128xf32> to vector<8x128xbf16>
    %c4_96 = arith.constant 4 : index
    %c0_97 = arith.constant 0 : index
    %c0_98 = arith.constant 0 : index
    %256 = vector.load %arg4[%c4_96, %c0_97, %c0_98] : memref<8x8x128xbf16, #tpu.memory_space<vmem>>, vector<1x8x128xbf16>
    %257 = vector.shape_cast %256 : vector<1x8x128xbf16> to vector<8x128xbf16>
    %258 = vector.shape_cast %255 : vector<8x128xbf16> to vector<1x8x128xbf16>
    tpu.vector_store %arg4[%c4_96, %c0_97, %c0_98], %258 {strides = array<i32>} : memref<8x8x128xbf16, #tpu.memory_space<vmem>>, vector<1x8x128xbf16>,
    %259 = arith.truncf %254 : vector<8x128xf32> to vector<8x128xbf16>
    %c5 = arith.constant 5 : index
    %c0_99 = arith.constant 0 : index
    %c0_100 = arith.constant 0 : index
    %260 = vector.load %arg2[%c5, %c0_99, %c0_100] : memref<8x8x512xbf16, #tpu.memory_space<vmem>>, vector<1x8x512xbf16>
    %261 = vector.shape_cast %260 : vector<1x8x512xbf16> to vector<8x512xbf16>
    %262 = vector.extract_strided_slice %261 {offsets = [0, 0], sizes = [8, 128], strides = [1, 1]} : vector<8x512xbf16> to vector<8x128xbf16>
    %263 = arith.extf %262 : vector<8x128xbf16> to vector<8x128xf32>
    %cst_101 = arith.constant dense<0.000000e+00> : vector<8x128xf32>
    %264 = tpu.matmul %259, %3, %cst_101 {dimension_numbers = #tpu.dot_dimension_numbers<[1], [0], [0], [1], [0, 0, 1, 1], [], []>} : vector<8x128xbf16>, vector<128x128xbf16>, vector<8x128xf32> -> vector<8x128xf32>
    %265 = arith.addf %263, %264 : vector<8x128xf32>
    %cst_102 = arith.constant 5.000000e-01 : f32
    %266 = vector.broadcast %cst_102 : f32 to vector<8x128xf32>
    %267 = arith.mulf %266, %265 : vector<8x128xf32>
    %268 = math.tanh %267 : vector<8x128xf32>
    %cst_103 = arith.constant 5.000000e-01 : f32
    %269 = vector.broadcast %cst_103 : f32 to vector<8x128xf32>
    %270 = arith.mulf %269, %268 : vector<8x128xf32>
    %cst_104 = arith.constant 5.000000e-01 : f32
    %271 = vector.broadcast %cst_104 : f32 to vector<8x128xf32>
    %272 = arith.addf %270, %271 : vector<8x128xf32>
    %273 = vector.extract_strided_slice %261 {offsets = [0, 128], sizes = [8, 128], strides = [1, 1]} : vector<8x512xbf16> to vector<8x128xbf16>
    %274 = arith.extf %273 : vector<8x128xbf16> to vector<8x128xf32>
    %cst_105 = arith.constant dense<0.000000e+00> : vector<8x128xf32>
    %275 = tpu.matmul %259, %4, %cst_105 {dimension_numbers = #tpu.dot_dimension_numbers<[1], [0], [0], [1], [0, 0, 1, 1], [], []>} : vector<8x128xbf16>, vector<128x128xbf16>, vector<8x128xf32> -> vector<8x128xf32>
    %276 = arith.addf %274, %275 : vector<8x128xf32>
    %cst_106 = arith.constant 5.000000e-01 : f32
    %277 = vector.broadcast %cst_106 : f32 to vector<8x128xf32>
    %278 = arith.mulf %277, %276 : vector<8x128xf32>
    %279 = math.tanh %278 : vector<8x128xf32>
    %cst_107 = arith.constant 5.000000e-01 : f32
    %280 = vector.broadcast %cst_107 : f32 to vector<8x128xf32>
    %281 = arith.mulf %280, %279 : vector<8x128xf32>
    %cst_108 = arith.constant 5.000000e-01 : f32
    %282 = vector.broadcast %cst_108 : f32 to vector<8x128xf32>
    %283 = arith.addf %281, %282 : vector<8x128xf32>
    %284 = vector.extract_strided_slice %261 {offsets = [0, 256], sizes = [8, 128], strides = [1, 1]} : vector<8x512xbf16> to vector<8x128xbf16>
    %285 = arith.extf %284 : vector<8x128xbf16> to vector<8x128xf32>
    %cst_109 = arith.constant dense<0.000000e+00> : vector<8x128xf32>
    %286 = tpu.matmul %259, %5, %cst_109 {dimension_numbers = #tpu.dot_dimension_numbers<[1], [0], [0], [1], [0, 0, 1, 1], [], []>} : vector<8x128xbf16>, vector<128x128xbf16>, vector<8x128xf32> -> vector<8x128xf32>
    %287 = arith.addf %285, %286 : vector<8x128xf32>
    %288 = math.tanh %287 : vector<8x128xf32>
    %289 = vector.extract_strided_slice %261 {offsets = [0, 384], sizes = [8, 128], strides = [1, 1]} : vector<8x512xbf16> to vector<8x128xbf16>
    %290 = arith.extf %289 : vector<8x128xbf16> to vector<8x128xf32>
    %cst_110 = arith.constant dense<0.000000e+00> : vector<8x128xf32>
    %291 = tpu.matmul %259, %6, %cst_110 {dimension_numbers = #tpu.dot_dimension_numbers<[1], [0], [0], [1], [0, 0, 1, 1], [], []>} : vector<8x128xbf16>, vector<128x128xbf16>, vector<8x128xf32> -> vector<8x128xf32>
    %292 = arith.addf %290, %291 : vector<8x128xf32>
    %cst_111 = arith.constant 5.000000e-01 : f32
    %293 = vector.broadcast %cst_111 : f32 to vector<8x128xf32>
    %294 = arith.mulf %293, %292 : vector<8x128xf32>
    %295 = math.tanh %294 : vector<8x128xf32>
    %cst_112 = arith.constant 5.000000e-01 : f32
    %296 = vector.broadcast %cst_112 : f32 to vector<8x128xf32>
    %297 = arith.mulf %296, %295 : vector<8x128xf32>
    %cst_113 = arith.constant 5.000000e-01 : f32
    %298 = vector.broadcast %cst_113 : f32 to vector<8x128xf32>
    %299 = arith.addf %297, %298 : vector<8x128xf32>
    %300 = arith.mulf %283, %252 : vector<8x128xf32>
    %301 = arith.mulf %272, %288 : vector<8x128xf32>
    %302 = arith.addf %300, %301 : vector<8x128xf32>
    %303 = math.tanh %302 : vector<8x128xf32>
    %304 = arith.mulf %299, %303 : vector<8x128xf32>
    %305 = arith.truncf %304 : vector<8x128xf32> to vector<8x128xbf16>
    %c5_114 = arith.constant 5 : index
    %c0_115 = arith.constant 0 : index
    %c0_116 = arith.constant 0 : index
    %306 = vector.load %arg4[%c5_114, %c0_115, %c0_116] : memref<8x8x128xbf16, #tpu.memory_space<vmem>>, vector<1x8x128xbf16>
    %307 = vector.shape_cast %306 : vector<1x8x128xbf16> to vector<8x128xbf16>
    %308 = vector.shape_cast %305 : vector<8x128xbf16> to vector<1x8x128xbf16>
    tpu.vector_store %arg4[%c5_114, %c0_115, %c0_116], %308 {strides = array<i32>} : memref<8x8x128xbf16, #tpu.memory_space<vmem>>, vector<1x8x128xbf16>,
    %309 = arith.truncf %304 : vector<8x128xf32> to vector<8x128xbf16>
    %c6 = arith.constant 6 : index
    %c0_117 = arith.constant 0 : index
    %c0_118 = arith.constant 0 : index
    %310 = vector.load %arg2[%c6, %c0_117, %c0_118] : memref<8x8x512xbf16, #tpu.memory_space<vmem>>, vector<1x8x512xbf16>
    %311 = vector.shape_cast %310 : vector<1x8x512xbf16> to vector<8x512xbf16>
    %312 = vector.extract_strided_slice %311 {offsets = [0, 0], sizes = [8, 128], strides = [1, 1]} : vector<8x512xbf16> to vector<8x128xbf16>
    %313 = arith.extf %312 : vector<8x128xbf16> to vector<8x128xf32>
    %cst_119 = arith.constant dense<0.000000e+00> : vector<8x128xf32>
    %314 = tpu.matmul %309, %3, %cst_119 {dimension_numbers = #tpu.dot_dimension_numbers<[1], [0], [0], [1], [0, 0, 1, 1], [], []>} : vector<8x128xbf16>, vector<128x128xbf16>, vector<8x128xf32> -> vector<8x128xf32>
    %315 = arith.addf %313, %314 : vector<8x128xf32>
    %cst_120 = arith.constant 5.000000e-01 : f32
    %316 = vector.broadcast %cst_120 : f32 to vector<8x128xf32>
    %317 = arith.mulf %316, %315 : vector<8x128xf32>
    %318 = math.tanh %317 : vector<8x128xf32>
    %cst_121 = arith.constant 5.000000e-01 : f32
    %319 = vector.broadcast %cst_121 : f32 to vector<8x128xf32>
    %320 = arith.mulf %319, %318 : vector<8x128xf32>
    %cst_122 = arith.constant 5.000000e-01 : f32
    %321 = vector.broadcast %cst_122 : f32 to vector<8x128xf32>
    %322 = arith.addf %320, %321 : vector<8x128xf32>
    %323 = vector.extract_strided_slice %311 {offsets = [0, 128], sizes = [8, 128], strides = [1, 1]} : vector<8x512xbf16> to vector<8x128xbf16>
    %324 = arith.extf %323 : vector<8x128xbf16> to vector<8x128xf32>
    %cst_123 = arith.constant dense<0.000000e+00> : vector<8x128xf32>
    %325 = tpu.matmul %309, %4, %cst_123 {dimension_numbers = #tpu.dot_dimension_numbers<[1], [0], [0], [1], [0, 0, 1, 1], [], []>} : vector<8x128xbf16>, vector<128x128xbf16>, vector<8x128xf32> -> vector<8x128xf32>
    %326 = arith.addf %324, %325 : vector<8x128xf32>
    %cst_124 = arith.constant 5.000000e-01 : f32
    %327 = vector.broadcast %cst_124 : f32 to vector<8x128xf32>
    %328 = arith.mulf %327, %326 : vector<8x128xf32>
    %329 = math.tanh %328 : vector<8x128xf32>
    %cst_125 = arith.constant 5.000000e-01 : f32
    %330 = vector.broadcast %cst_125 : f32 to vector<8x128xf32>
    %331 = arith.mulf %330, %329 : vector<8x128xf32>
    %cst_126 = arith.constant 5.000000e-01 : f32
    %332 = vector.broadcast %cst_126 : f32 to vector<8x128xf32>
    %333 = arith.addf %331, %332 : vector<8x128xf32>
    %334 = vector.extract_strided_slice %311 {offsets = [0, 256], sizes = [8, 128], strides = [1, 1]} : vector<8x512xbf16> to vector<8x128xbf16>
    %335 = arith.extf %334 : vector<8x128xbf16> to vector<8x128xf32>
    %cst_127 = arith.constant dense<0.000000e+00> : vector<8x128xf32>
    %336 = tpu.matmul %309, %5, %cst_127 {dimension_numbers = #tpu.dot_dimension_numbers<[1], [0], [0], [1], [0, 0, 1, 1], [], []>} : vector<8x128xbf16>, vector<128x128xbf16>, vector<8x128xf32> -> vector<8x128xf32>
    %337 = arith.addf %335, %336 : vector<8x128xf32>
    %338 = math.tanh %337 : vector<8x128xf32>
    %339 = vector.extract_strided_slice %311 {offsets = [0, 384], sizes = [8, 128], strides = [1, 1]} : vector<8x512xbf16> to vector<8x128xbf16>
    %340 = arith.extf %339 : vector<8x128xbf16> to vector<8x128xf32>
    %cst_128 = arith.constant dense<0.000000e+00> : vector<8x128xf32>
    %341 = tpu.matmul %309, %6, %cst_128 {dimension_numbers = #tpu.dot_dimension_numbers<[1], [0], [0], [1], [0, 0, 1, 1], [], []>} : vector<8x128xbf16>, vector<128x128xbf16>, vector<8x128xf32> -> vector<8x128xf32>
    %342 = arith.addf %340, %341 : vector<8x128xf32>
    %cst_129 = arith.constant 5.000000e-01 : f32
    %343 = vector.broadcast %cst_129 : f32 to vector<8x128xf32>
    %344 = arith.mulf %343, %342 : vector<8x128xf32>
    %345 = math.tanh %344 : vector<8x128xf32>
    %cst_130 = arith.constant 5.000000e-01 : f32
    %346 = vector.broadcast %cst_130 : f32 to vector<8x128xf32>
    %347 = arith.mulf %346, %345 : vector<8x128xf32>
    %cst_131 = arith.constant 5.000000e-01 : f32
    %348 = vector.broadcast %cst_131 : f32 to vector<8x128xf32>
    %349 = arith.addf %347, %348 : vector<8x128xf32>
    %350 = arith.mulf %333, %302 : vector<8x128xf32>
    %351 = arith.mulf %322, %338 : vector<8x128xf32>
    %352 = arith.addf %350, %351 : vector<8x128xf32>
    %353 = math.tanh %352 : vector<8x128xf32>
    %354 = arith.mulf %349, %353 : vector<8x128xf32>
    %355 = arith.truncf %354 : vector<8x128xf32> to vector<8x128xbf16>
    %c6_132 = arith.constant 6 : index
    %c0_133 = arith.constant 0 : index
    %c0_134 = arith.constant 0 : index
    %356 = vector.load %arg4[%c6_132, %c0_133, %c0_134] : memref<8x8x128xbf16, #tpu.memory_space<vmem>>, vector<1x8x128xbf16>
    %357 = vector.shape_cast %356 : vector<1x8x128xbf16> to vector<8x128xbf16>
    %358 = vector.shape_cast %355 : vector<8x128xbf16> to vector<1x8x128xbf16>
    tpu.vector_store %arg4[%c6_132, %c0_133, %c0_134], %358 {strides = array<i32>} : memref<8x8x128xbf16, #tpu.memory_space<vmem>>, vector<1x8x128xbf16>,
    %359 = arith.truncf %354 : vector<8x128xf32> to vector<8x128xbf16>
    %c7 = arith.constant 7 : index
    %c0_135 = arith.constant 0 : index
    %c0_136 = arith.constant 0 : index
    %360 = vector.load %arg2[%c7, %c0_135, %c0_136] : memref<8x8x512xbf16, #tpu.memory_space<vmem>>, vector<1x8x512xbf16>
    %361 = vector.shape_cast %360 : vector<1x8x512xbf16> to vector<8x512xbf16>
    %362 = vector.extract_strided_slice %361 {offsets = [0, 0], sizes = [8, 128], strides = [1, 1]} : vector<8x512xbf16> to vector<8x128xbf16>
    %363 = arith.extf %362 : vector<8x128xbf16> to vector<8x128xf32>
    %cst_137 = arith.constant dense<0.000000e+00> : vector<8x128xf32>
    %364 = tpu.matmul %359, %3, %cst_137 {dimension_numbers = #tpu.dot_dimension_numbers<[1], [0], [0], [1], [0, 0, 1, 1], [], []>} : vector<8x128xbf16>, vector<128x128xbf16>, vector<8x128xf32> -> vector<8x128xf32>
    %365 = arith.addf %363, %364 : vector<8x128xf32>
    %cst_138 = arith.constant 5.000000e-01 : f32
    %366 = vector.broadcast %cst_138 : f32 to vector<8x128xf32>
    %367 = arith.mulf %366, %365 : vector<8x128xf32>
    %368 = math.tanh %367 : vector<8x128xf32>
    %cst_139 = arith.constant 5.000000e-01 : f32
    %369 = vector.broadcast %cst_139 : f32 to vector<8x128xf32>
    %370 = arith.mulf %369, %368 : vector<8x128xf32>
    %cst_140 = arith.constant 5.000000e-01 : f32
    %371 = vector.broadcast %cst_140 : f32 to vector<8x128xf32>
    %372 = arith.addf %370, %371 : vector<8x128xf32>
    %373 = vector.extract_strided_slice %361 {offsets = [0, 128], sizes = [8, 128], strides = [1, 1]} : vector<8x512xbf16> to vector<8x128xbf16>
    %374 = arith.extf %373 : vector<8x128xbf16> to vector<8x128xf32>
    %cst_141 = arith.constant dense<0.000000e+00> : vector<8x128xf32>
    %375 = tpu.matmul %359, %4, %cst_141 {dimension_numbers = #tpu.dot_dimension_numbers<[1], [0], [0], [1], [0, 0, 1, 1], [], []>} : vector<8x128xbf16>, vector<128x128xbf16>, vector<8x128xf32> -> vector<8x128xf32>
    %376 = arith.addf %374, %375 : vector<8x128xf32>
    %cst_142 = arith.constant 5.000000e-01 : f32
    %377 = vector.broadcast %cst_142 : f32 to vector<8x128xf32>
    %378 = arith.mulf %377, %376 : vector<8x128xf32>
    %379 = math.tanh %378 : vector<8x128xf32>
    %cst_143 = arith.constant 5.000000e-01 : f32
    %380 = vector.broadcast %cst_143 : f32 to vector<8x128xf32>
    %381 = arith.mulf %380, %379 : vector<8x128xf32>
    %cst_144 = arith.constant 5.000000e-01 : f32
    %382 = vector.broadcast %cst_144 : f32 to vector<8x128xf32>
    %383 = arith.addf %381, %382 : vector<8x128xf32>
    %384 = vector.extract_strided_slice %361 {offsets = [0, 256], sizes = [8, 128], strides = [1, 1]} : vector<8x512xbf16> to vector<8x128xbf16>
    %385 = arith.extf %384 : vector<8x128xbf16> to vector<8x128xf32>
    %cst_145 = arith.constant dense<0.000000e+00> : vector<8x128xf32>
    %386 = tpu.matmul %359, %5, %cst_145 {dimension_numbers = #tpu.dot_dimension_numbers<[1], [0], [0], [1], [0, 0, 1, 1], [], []>} : vector<8x128xbf16>, vector<128x128xbf16>, vector<8x128xf32> -> vector<8x128xf32>
    %387 = arith.addf %385, %386 : vector<8x128xf32>
    %388 = math.tanh %387 : vector<8x128xf32>
    %389 = vector.extract_strided_slice %361 {offsets = [0, 384], sizes = [8, 128], strides = [1, 1]} : vector<8x512xbf16> to vector<8x128xbf16>
    %390 = arith.extf %389 : vector<8x128xbf16> to vector<8x128xf32>
    %cst_146 = arith.constant dense<0.000000e+00> : vector<8x128xf32>
    %391 = tpu.matmul %359, %6, %cst_146 {dimension_numbers = #tpu.dot_dimension_numbers<[1], [0], [0], [1], [0, 0, 1, 1], [], []>} : vector<8x128xbf16>, vector<128x128xbf16>, vector<8x128xf32> -> vector<8x128xf32>
    %392 = arith.addf %390, %391 : vector<8x128xf32>
    %cst_147 = arith.constant 5.000000e-01 : f32
    %393 = vector.broadcast %cst_147 : f32 to vector<8x128xf32>
    %394 = arith.mulf %393, %392 : vector<8x128xf32>
    %395 = math.tanh %394 : vector<8x128xf32>
    %cst_148 = arith.constant 5.000000e-01 : f32
    %396 = vector.broadcast %cst_148 : f32 to vector<8x128xf32>
    %397 = arith.mulf %396, %395 : vector<8x128xf32>
    %cst_149 = arith.constant 5.000000e-01 : f32
    %398 = vector.broadcast %cst_149 : f32 to vector<8x128xf32>
    %399 = arith.addf %397, %398 : vector<8x128xf32>
    %400 = arith.mulf %383, %352 : vector<8x128xf32>
    %401 = arith.mulf %372, %388 : vector<8x128xf32>
    %402 = arith.addf %400, %401 : vector<8x128xf32>
    %403 = math.tanh %402 : vector<8x128xf32>
    %404 = arith.mulf %399, %403 : vector<8x128xf32>
    %405 = arith.truncf %404 : vector<8x128xf32> to vector<8x128xbf16>
    %c7_150 = arith.constant 7 : index
    %c0_151 = arith.constant 0 : index
    %c0_152 = arith.constant 0 : index
    %406 = vector.load %arg4[%c7_150, %c0_151, %c0_152] : memref<8x8x128xbf16, #tpu.memory_space<vmem>>, vector<1x8x128xbf16>
    %407 = vector.shape_cast %406 : vector<1x8x128xbf16> to vector<8x128xbf16>
    %408 = vector.shape_cast %405 : vector<8x128xbf16> to vector<1x8x128xbf16>
    tpu.vector_store %arg4[%c7_150, %c0_151, %c0_152], %408 {strides = array<i32>} : memref<8x8x128xbf16, #tpu.memory_space<vmem>>, vector<1x8x128xbf16>,
    %c0_153 = arith.constant 0 : index
    %c0_154 = arith.constant 0 : index
    %409 = vector.load %arg7[%c0_153, %c0_154] : memref<8x128xf32, #tpu.memory_space<vmem>>, vector<8x128xf32>
    tpu.vector_store %arg7[%c0_153, %c0_154], %404 {strides = array<i32>} : memref<8x128xf32, #tpu.memory_space<vmem>>, vector<8x128xf32>,
    %c0_155 = arith.constant 0 : index
    %c0_156 = arith.constant 0 : index
    %410 = vector.load %arg8[%c0_155, %c0_156] : memref<8x128xf32, #tpu.memory_space<vmem>>, vector<8x128xf32>
    tpu.vector_store %arg8[%c0_155, %c0_156], %402 {strides = array<i32>} : memref<8x128xf32, #tpu.memory_space<vmem>>, vector<8x128xf32>,
    %c0_i32_157 = arith.constant 0 : i32
    %411 = arith.cmpi eq, %arg1, %c0_i32_157 : i32
    %412 = arith.extui %411 : i1 to i32
    %c0_i32_158 = arith.constant 0 : i32
    %413 = arith.cmpi ne, %412, %c0_i32_158 : i32
    scf.if %413 {
      %c0_159 = arith.constant 0 : index
      %c0_160 = arith.constant 0 : index
      %414 = vector.load %arg5[%c0_159, %c0_160] : memref<8x128xf32, #tpu.memory_space<vmem>>, vector<8x128xf32>
      tpu.vector_store %arg5[%c0_159, %c0_160], %404 {strides = array<i32>} : memref<8x128xf32, #tpu.memory_space<vmem>>, vector<8x128xf32>,
      %c0_161 = arith.constant 0 : index
      %c0_162 = arith.constant 0 : index
      %415 = vector.load %arg6[%c0_161, %c0_162] : memref<8x128xf32, #tpu.memory_space<vmem>>, vector<8x128xf32>
      tpu.vector_store %arg6[%c0_161, %c0_162], %402 {strides = array<i32>} : memref<8x128xf32, #tpu.memory_space<vmem>>, vector<8x128xf32>,
    } else {
    }
    return
  }
  func.func @transform_0(%arg0: i32, %arg1: i32) -> (i32, i32, i32) {
    %c0_i32 = arith.constant 0 : i32
    %c0_i32_0 = arith.constant 0 : i32
    return %arg1, %arg0, %c0_i32 : i32, i32, i32
  }
  func.func @transform_1(%arg0: i32, %arg1: i32) -> (i32, i32) {
    %c0_i32 = arith.constant 0 : i32
    %c0_i32_0 = arith.constant 0 : i32
    %c0_i32_1 = arith.constant 0 : i32
    return %c0_i32, %c0_i32_0 : i32, i32
  }
  func.func @transform_2(%arg0: i32, %arg1: i32) -> (i32, i32, i32) {
    %c0_i32 = arith.constant 0 : i32
    %c0_i32_0 = arith.constant 0 : i32
    return %arg1, %arg0, %c0_i32 : i32, i32, i32
  }
  func.func @transform_3(%arg0: i32, %arg1: i32) -> (i32, i32) {
    %c0_i32 = arith.constant 0 : i32
    %c0_i32_0 = arith.constant 0 : i32
    return %arg0, %c0_i32 : i32, i32
  }
  func.func @transform_4(%arg0: i32, %arg1: i32) -> (i32, i32) {
    %c0_i32 = arith.constant 0 : i32
    %c0_i32_0 = arith.constant 0 : i32
    return %arg0, %c0_i32 : i32, i32
  }
}

</mosaic_0001>

<bundles_post_ra>
// kernel: tpu_custom_call.1
= control target key start
LH: loop header
LB: loop body
LE: loop exit
PB: predicated region body
PF: predicated region fallthrough
CT: control target
= control target key end

     0   :  { %10 = vsyncpa [#allocation5], 0  ;;  %s3959_s0 = inlined_call_operand.hbm [shape: bf16[8,8,512], index: 0, kind: input, shape index: {}]   ;;  %s3960_s1 = inlined_call_operand.hbm [shape: bf16[128,512], index: 1, kind: input, shape index: {}]   ;;  %s3961_s2 = inlined_call_operand.hbm [shape: bf16[8,8,128], index: 2, kind: output, shape index: {0}]   ;;  %s3962_s3 = inlined_call_operand.hbm [shape: f32[8,128], index: 3, kind: output, shape index: {1}]   ;;  %s3963_s4 = inlined_call_operand.hbm [shape: f32[8,128], index: 4, kind: output, shape index: {2}]  }
   0x1   :  { %11 = vsyncpa [#allocation8], 0 }
   0x2   :  { %12 = vsyncpa [#allocation6], 0 }
   0x3   :  { %13 = vsyncpa [#allocation11], 0  ;;  %s3168_s15 = smov [#allocation4]  }
   0x4   :  { %s19_s16 = sshll.u32 %s3168_s15, 4  ;;  %s20_s16 = int_to_ptr.vmem [resolvable:$true] %s19_s16 }
   0x5   :  { %s3068_s17 = scalar_lea.vmem %s20_s16, 2048  ;;  %p3073_p1 = scmp.lt.s32.totalorder %s20_s16, %s20_s16 }
   0x6   :  { %p3069_p0 = scmp.ne.s32.totalorder %s20_s16, %s3068_s17  ;;  %p3074_p2 = scmp.lt.s32.totalorder %s3068_s17, %s3068_s17 }
   0x8   :  { %p3075_p3 = por %p3074_p2, %p3073_p1 }
   0xa   :  { %p3076_p4 = pnand %p3075_p3, %p3069_p0 }
   0xc   :  { %3079 = shalt.err (!%p3076_p4)
}
   0xd   :  { %s3169_s18 = smov 256   ;;  %s3170_s19 = smov 16  }
   0xe   :  { %25 = dma.hbm_to_vmem [thread:$0]  %s3959_s0, 2048, %s20_s16, [#allocation5], %s3169_s18, %s3169_s18, %s3170_s19  }
   0xf   :  { %s3171_s22 = smov [#allocation7]  }
  0x10   :  { %s31_s23 = sshll.u32 %s3171_s22, 4  ;;  %s32_s23 = int_to_ptr.vmem [resolvable:$true] %s31_s23 }
  0x11   :  { %s3088_s24 = scalar_lea.vmem %s32_s23, 4096  ;;  %p3093_p6 = scmp.lt.s32.totalorder %s32_s23, %s32_s23 }
  0x12   :  { %p3089_p5 = scmp.ne.s32.totalorder %s32_s23, %s3088_s24  ;;  %p3094_p7 = scmp.lt.s32.totalorder %s3088_s24, %s3088_s24 }
  0x14   :  { %p3095_p8 = por %p3094_p7, %p3093_p6 }
  0x16   :  { %p3096_p9 = pnand %p3095_p8, %p3089_p5 }
  0x18   :  { %3099 = shalt.err (!%p3096_p9)
}
  0x19   :  { %37 = dma.hbm_to_vmem [thread:$0]  %s3960_s1, 4096, %s32_s23, [#allocation8], %s3169_s18, %s3169_s18, %s3170_s19  }
  0x1a   :  { %3160 = dma.done.wait [#allocation5], 2048  }
  0x1b   :  { %3161 = vsyncadd [#allocation5], 4294965248 }
  0x1c   :  { %3162 = dma.done.wait [#allocation8], 4096  }
  0x1d   :  { %3163 = vsyncadd [#allocation8], 4294963200  ;;  %v3172_v0 = vmov 0.0   ;;  %vm3173_vm0 = vmmov 0   ;;  %v3217_v1 = vld [vmem:[#allocation7 + $0xe0] ss:$16 sps:$4 sm:$0xff]  }
  0x1e   :  { %2264 = vmatprep.subr.bf16.mxu0 %v3172_v0  ;;  %2284 = vmatprep.subr.bf16.mxu1 %v3172_v0  ;;  %v3219_v2 = vld [vmem:[#allocation7 + $0xc0] ss:$16 sps:$4 sm:$0xff]   ;;  %v3222_v3 = vld [vmem:[#allocation7 + $0xe4] ss:$16 sps:$4 sm:$0xff]   ;;  %v3278_v17 = vld [vmem:[#allocation7 + $0xe8] ss:$16 sps:$4 sm:$0xff]  }
  0x1f   :  { %2280 = vmatprep.mubr.msk.bf16.mxu0 %vm3173_vm0, %v3172_v0  ;;  %2300 = vmatprep.mubr.msk.bf16.mxu1 %vm3173_vm0, %v3172_v0  ;;  %v3226_v4 = vld [vmem:[#allocation7 + $0xc4] ss:$16 sps:$4 sm:$0xff]   ;;  %v3230_v5 = vld [vmem:[#allocation7 + $0xa0] ss:$16 sps:$4 sm:$0xff]   ;;  %v3282_v18 = vld [vmem:[#allocation7 + $0xec] ss:$16 sps:$4 sm:$0xff]  }
  0x20   :  { %2265 = vmatpush3.bf16.msra.mxu0 %v3217_v1  ;;  %2285 = vmatpush3.bf16.msra.mxu1 %v3222_v3  ;;  %v3234_v6 = vld [vmem:[#allocation7 + $0xa4] ss:$16 sps:$4 sm:$0xff]   ;;  %v3238_v7 = vld [vmem:[#allocation7 + $0x80] ss:$16 sps:$4 sm:$0xff]   ;;  %v3174_v19 = vmov 0.0|0.0   ;;  %v119_v50 = vld [vmem:[#allocation4 + $0x8] sm:$0xff] }
  0x21   :  { %2266 = vmatprep.subr.bf16.mxu0 %v3172_v0  ;;  %2286 = vmatprep.subr.bf16.mxu1 %v3172_v0  ;;  %v3242_v8 = vld [vmem:[#allocation7 + $0x84] ss:$16 sps:$4 sm:$0xff]   ;;  %v3246_v9 = vld [vmem:[#allocation7 + $0x60] ss:$16 sps:$4 sm:$0xff]   ;;  %v3286_v20 = vld [vmem:[#allocation7 + $0xc8] ss:$16 sps:$4 sm:$0xff]   ;;  %v311_v52 = vunpack.c.l.bf16 %v119_v50 }
  0x22   :  { %v3250_v10 = vld [vmem:[#allocation7 + $0x64] ss:$16 sps:$4 sm:$0xff]   ;;  %v3254_v11 = vld [vmem:[#allocation7 + $0x40] ss:$16 sps:$4 sm:$0xff]   ;;  %v3292_v21 = vld [vmem:[#allocation7 + $0xcc] ss:$16 sps:$4 sm:$0xff]  }
  0x23   :  { %v3258_v12 = vld [vmem:[#allocation7 + $0x44] ss:$16 sps:$4 sm:$0xff]   ;;  %v3262_v13 = vld [vmem:[#allocation7 + $0x20] ss:$16 sps:$4 sm:$0xff]   ;;  %v3298_v22 = vld [vmem:[#allocation7 + $0xa8] ss:$16 sps:$4 sm:$0xff]  }
  0x24   :  { %2267 = vmatpush3.bf16.msra.mxu0 %v3219_v2  ;;  %2287 = vmatpush3.bf16.msra.mxu1 %v3226_v4  ;;  %v3266_v14 = vld [vmem:[#allocation7 + $0x24] ss:$16 sps:$4 sm:$0xff]   ;;  %v3270_v15 = vld [vmem:[#allocation7] ss:$16 sps:$4 sm:$0xff]   ;;  %v3302_v23 = vld [vmem:[#allocation7 + $0xac] ss:$16 sps:$4 sm:$0xff]  }
  0x25   :  { %2268 = vmatprep.subr.bf16.mxu0 %v3172_v0  ;;  %2288 = vmatprep.subr.bf16.mxu1 %v3172_v0  ;;  %v3274_v16 = vld [vmem:[#allocation7 + $0x4] ss:$16 sps:$4 sm:$0xff]   ;;  %v3306_v24 = vld [vmem:[#allocation7 + $0x88] ss:$16 sps:$4 sm:$0xff]   ;;  %v3310_v25 = vld [vmem:[#allocation7 + $0x8c] ss:$16 sps:$4 sm:$0xff]  }
  0x26   :  { %v3314_v26 = vld [vmem:[#allocation7 + $0x68] ss:$16 sps:$4 sm:$0xff]   ;;  %v3318_v27 = vld [vmem:[#allocation7 + $0x6c] ss:$16 sps:$4 sm:$0xff]   ;;  %v118_v41 = vld [vmem:[#allocation4] sm:$0xff]  ;;  %v403_v51 = vrot.slane %v119_v50, 4 }
  0x27   :  { %v3322_v28 = vld [vmem:[#allocation7 + $0x48] ss:$16 sps:$4 sm:$0xff]   ;;  %v3326_v29 = vld [vmem:[#allocation7 + $0x4c] ss:$16 sps:$4 sm:$0xff]   ;;  %v215_v43 = vrot.slane %v118_v41, 4  ;;  %v120_v45 = vunpack.c.l.bf16 %v118_v41  ;;  %s3175_s0 = smov [#allocation10]  }
  0x28   :  { %2269 = vmatpush3.bf16.msra.mxu0 %v3230_v5  ;;  %2289 = vmatpush3.bf16.msra.mxu1 %v3234_v6  ;;  %v3330_v30 = vld [vmem:[#allocation7 + $0x28] ss:$16 sps:$4 sm:$0xff]   ;;  %v3334_v31 = vld [vmem:[#allocation7 + $0x2c] ss:$16 sps:$4 sm:$0xff]   ;;  %v405_v53 = vunpack.c.l.bf16 %v403_v51  ;;  %s1917_s1 = sshll.u32 %s3175_s0, 4  ;;  %s3176_s27 = smov [#allocation9]   ;;  %s1918_s1 = int_to_ptr.vmem [resolvable:$true] %s1917_s1 }
  0x29   :  { %2270 = vmatprep.subr.bf16.mxu0 %v3172_v0  ;;  %2290 = vmatprep.subr.bf16.mxu1 %v3172_v0  ;;  %v3338_v32 = vld [vmem:[#allocation7 + $0x8] ss:$16 sps:$4 sm:$0xff]   ;;  %v3342_v33 = vld [vmem:[#allocation7 + $0xc] ss:$16 sps:$4 sm:$0xff]   ;;  %v217_v44 = vunpack.c.l.bf16 %v215_v43  ;;  %s1904_s28 = sshll.u32 %s3176_s27, 4  ;;  %s3177_s29 = smov [#allocation12]   ;;  %s3943_s28 = int_to_ptr.vmem [resolvable:$true] %s1904_s28 }
  0x2a   :  { %s1927_s30 = sshll.u32 %s3177_s29, 4  ;;  %s3100_s5 = scalar_lea.vmem %s1918_s1, 128  ;;  %s1928_s30 = int_to_ptr.vmem [resolvable:$true] %s1927_s30 }
  0x2b   :  { %p3101_p10 = scmp.ne.s32.totalorder %s1918_s1, %s3100_s5  ;;  %p3105_p11 = scmp.lt.s32.totalorder %s1918_s1, %s1918_s1 }
  0x2c   :  { %2271 = vmatpush3.bf16.msra.mxu0 %v3238_v7  ;;  %2291 = vmatpush3.bf16.msra.mxu1 %v3242_v8  ;;  %p3106_p12 = scmp.lt.s32.totalorder %s3100_s5, %s3100_s5 }
  0x2d   :  { %2272 = vmatprep.subr.bf16.mxu0 %v3172_v0  ;;  %2292 = vmatprep.subr.bf16.mxu1 %v3172_v0 }
  0x2e   :  { %p3107_p13 = por %p3106_p12, %p3105_p11 }
  0x30   :  { %2273 = vmatpush3.bf16.msra.mxu0 %v3246_v9  ;;  %2293 = vmatpush3.bf16.msra.mxu1 %v3250_v10  ;;  %p3108_p0 = pnand %p3107_p13, %p3101_p10 }
  0x31   :  { %2274 = vmatprep.subr.bf16.mxu0 %v3172_v0  ;;  %2294 = vmatprep.subr.bf16.mxu1 %v3172_v0 }
  0x34   :  { %2275 = vmatpush3.bf16.msra.mxu0 %v3254_v11  ;;  %2295 = vmatpush3.bf16.msra.mxu1 %v3258_v12 }
  0x35   :  { %2276 = vmatprep.subr.bf16.mxu0 %v3172_v0  ;;  %2296 = vmatprep.subr.bf16.mxu1 %v3172_v0 }
  0x38   :  { %2277 = vmatpush3.bf16.msra.mxu0 %v3262_v13  ;;  %2297 = vmatpush3.bf16.msra.mxu1 %v3266_v14 }
  0x39   :  { %2278 = vmatprep.subr.bf16.mxu0 %v3172_v0  ;;  %2298 = vmatprep.subr.bf16.mxu1 %v3172_v0 }
  0x3c   :  { %2279 = vmatpush3.bf16.msra.mxu0 %v3270_v15  ;;  %2299 = vmatpush3.bf16.msra.mxu1 %v3274_v16 }
  0x3d   :  { %2304 = vmatprep.subr.bf16.mxu0 %v3172_v0  ;;  %2324 = vmatprep.subr.bf16.mxu1 %v3172_v0 }
  0x3f   :  { %2281 = vmatmul.mubr.bf16.vlgmr.msra.gmra.mxu0 %v3174_v19  ;;  %2301 = vmatmul.mubr.bf16.vlgmr.msra.gmra.mxu1 %v3174_v19 }
  0x40   :  { %2305 = vmatpush3.bf16.msra.mxu0 %v3278_v17  ;;  %2320 = vmatprep.mubr.msk.bf16.mxu0 %vm3173_vm0, %v3172_v0 }
  0x41   :  { %2306 = vmatprep.subr.bf16.mxu0 %v3172_v0  ;;  %2325 = vmatpush3.bf16.msra.mxu1 %v3282_v18 }
  0x42   :  { %2340 = vmatprep.mubr.msk.bf16.mxu1 %vm3173_vm0, %v3172_v0  ;;  %2326 = vmatprep.subr.bf16.mxu1 %v3172_v0 }
  0x44   :  { %2307 = vmatpush3.bf16.msra.mxu0 %v3286_v20 }
  0x45   :  { %2308 = vmatprep.subr.bf16.mxu0 %v3172_v0  ;;  %2327 = vmatpush3.bf16.msra.mxu1 %v3292_v21 }
  0x46   :  { %2328 = vmatprep.subr.bf16.mxu1 %v3172_v0 }
  0x48   :  { %2309 = vmatpush3.bf16.msra.mxu0 %v3298_v22 }
  0x49   :  { %2310 = vmatprep.subr.bf16.mxu0 %v3172_v0  ;;  %2329 = vmatpush3.bf16.msra.mxu1 %v3302_v23 }
  0x4a   :  { %2330 = vmatprep.subr.bf16.mxu1 %v3172_v0 }
  0x4c   :  { %2311 = vmatpush3.bf16.msra.mxu0 %v3306_v24 }
  0x4d   :  { %2312 = vmatprep.subr.bf16.mxu0 %v3172_v0  ;;  %2331 = vmatpush3.bf16.msra.mxu1 %v3310_v25 }
  0x4e   :  { %2332 = vmatprep.subr.bf16.mxu1 %v3172_v0 }
  0x50   :  { %2313 = vmatpush3.bf16.msra.mxu0 %v3314_v26 }
  0x51   :  { %2314 = vmatprep.subr.bf16.mxu0 %v3172_v0  ;;  %2333 = vmatpush3.bf16.msra.mxu1 %v3318_v27 }
  0x52   :  { %2334 = vmatprep.subr.bf16.mxu1 %v3172_v0 }
  0x54   :  { %2315 = vmatpush3.bf16.msra.mxu0 %v3322_v28 }
  0x55   :  { %2316 = vmatprep.subr.bf16.mxu0 %v3172_v0  ;;  %2335 = vmatpush3.bf16.msra.mxu1 %v3326_v29 }
  0x56   :  { %2336 = vmatprep.subr.bf16.mxu1 %v3172_v0 }
  0x58   :  { %2317 = vmatpush3.bf16.msra.mxu0 %v3330_v30 }
  0x59   :  { %2318 = vmatprep.subr.bf16.mxu0 %v3172_v0  ;;  %2337 = vmatpush3.bf16.msra.mxu1 %v3334_v31 }
  0x5a   :  { %2338 = vmatprep.subr.bf16.mxu1 %v3172_v0 }
  0x5c   :  { %2319 = vmatpush3.bf16.msra.mxu0 %v3338_v32 }
  0x5d   :  { %2344 = vmatprep.subr.bf16.mxu0 %v3172_v0  ;;  %2339 = vmatpush3.bf16.msra.mxu1 %v3342_v33 }
  0x5e   :  { %2364 = vmatprep.subr.bf16.mxu1 %v3172_v0 }
  0x5f   :  { %2321 = vmatmul.mubr.bf16.vlgmr.msra.gmra.mxu0 %v3174_v19 }
  0x60   :  { %2345 = vmatpush3.bf16.msra.mxu0 %v3217_v1  ;;  %2360 = vmatprep.mubr.msk.bf16.mxu0 %vm3173_vm0, %v3172_v0 }
  0x61   :  { %2341 = vmatmul.mubr.bf16.vlgmr.msra.gmra.mxu1 %v3174_v19  ;;  %2346 = vmatprep.subr.bf16.mxu0 %v3172_v0 }
  0x62   :  { %2365 = vmatpush3.bf16.msra.mxu1 %v3222_v3  ;;  %2380 = vmatprep.mubr.msk.bf16.mxu1 %vm3173_vm0, %v3172_v0 }
  0x63   :  { %2366 = vmatprep.subr.bf16.mxu1 %v3172_v0 }
  0x64   :  { %2347 = vmatpush3.bf16.msra.mxu0 %v3219_v2 }
  0x65   :  { %2348 = vmatprep.subr.bf16.mxu0 %v3172_v0 }
  0x66   :  { %2367 = vmatpush3.bf16.msra.mxu1 %v3226_v4 }
  0x67   :  { %2368 = vmatprep.subr.bf16.mxu1 %v3172_v0 }
  0x68   :  { %2349 = vmatpush3.bf16.msra.mxu0 %v3230_v5 }
  0x69   :  { %2350 = vmatprep.subr.bf16.mxu0 %v3172_v0 }
  0x6a   :  { %2369 = vmatpush3.bf16.msra.mxu1 %v3234_v6 }
  0x6b   :  { %2370 = vmatprep.subr.bf16.mxu1 %v3172_v0 }
  0x6c   :  { %2351 = vmatpush3.bf16.msra.mxu0 %v3238_v7 }
  0x6d   :  { %2352 = vmatprep.subr.bf16.mxu0 %v3172_v0 }
  0x6e   :  { %2371 = vmatpush3.bf16.msra.mxu1 %v3242_v8 }
  0x6f   :  { %2372 = vmatprep.subr.bf16.mxu1 %v3172_v0 }
  0x70   :  { %2353 = vmatpush3.bf16.msra.mxu0 %v3246_v9 }
  0x71   :  { %2354 = vmatprep.subr.bf16.mxu0 %v3172_v0 }
  0x72   :  { %2373 = vmatpush3.bf16.msra.mxu1 %v3250_v10 }
  0x73   :  { %2374 = vmatprep.subr.bf16.mxu1 %v3172_v0 }
  0x74   :  { %2355 = vmatpush3.bf16.msra.mxu0 %v3254_v11 }
  0x75   :  { %2356 = vmatprep.subr.bf16.mxu0 %v3172_v0 }
  0x76   :  { %2375 = vmatpush3.bf16.msra.mxu1 %v3258_v12 }
  0x77   :  { %2376 = vmatprep.subr.bf16.mxu1 %v3172_v0 }
  0x78   :  { %2357 = vmatpush3.bf16.msra.mxu0 %v3262_v13 }
  0x79   :  { %2358 = vmatprep.subr.bf16.mxu0 %v3172_v0 }
  0x7a   :  { %2377 = vmatpush3.bf16.msra.mxu1 %v3266_v14 }
  0x7b   :  { %2378 = vmatprep.subr.bf16.mxu1 %v3172_v0 }
  0x7c   :  { %2359 = vmatpush3.bf16.msra.mxu0 %v3270_v15 }
  0x7d   :  { %2384 = vmatprep.subr.bf16.mxu0 %v3172_v0 }
  0x7e   :  { %2379 = vmatpush3.bf16.msra.mxu1 %v3274_v16 }
  0x7f   :  { %2404 = vmatprep.subr.bf16.mxu1 %v3172_v0 }
  0xff   :  { %v203_v34 = vpop.f32.mrf.mxu0  ;;  %v300_v36 = vpop.f32.mrf.mxu1 }
 0x100   :  { %v306_v46 = vadd.f32 %v300_v36, %v217_v44  ;;  %v209_v47 = vadd.f32 %v203_v34, %v120_v45 }
 0x101   :  { %v2282_v35 = vpop.f32.mrf.mxu0  ;;  %v2302_v38 = vpop.f32.mrf.mxu1 }
 0x102   :  { %v307_v48 = vmul.f32 0.5, %v306_v46  ;;  %v210_v49 = vmul.f32 0.5, %v209_v47 }
 0x103   :  { %v206_v37 = vpop.f32.mrf.mxu0  ;;  %v303_v40 = vpop.f32.mrf.mxu1 }
 0x104   :  { %2948 = vtanh.f32 %v307_v48 }
 0x105   :  { %v2283_v39 = vpop.f32.mrf.mxu0  ;;  %v2303_v42 = vpop.f32.mrf.mxu1  ;;  %2950 = vtanh.f32 %v210_v49 }
 0x111   :  { %v2949_v61 = vpop.eup %2948 }
 0x112   :  { %v2951_v34 = vpop.eup %2950  ;;  %v309_v36 = vmul.f32 0.5, %v2949_v61 }
 0x113   :  { %v212_v37 = vmul.f32 0.5, %v2951_v34 }
 0x114   :  { %v310_v38 = vadd.f32 0.5, %v309_v36 }
 0x115   :  { %v213_v39 = vadd.f32 0.5, %v212_v37 }
 0x116   :  { %v499_v41 = vmul.f32 0.0, %v310_v38 }
 0x11f   :  { %v394_v54 = vpop.f32.mrf.mxu0 }
 0x120   :  { %v400_v55 = vadd.f32 %v394_v54, %v311_v52 }
 0x121   :  { %v2322_v56 = vpop.f32.mrf.mxu0  ;;  %v488_v57 = vpop.f32.mrf.mxu1 }
 0x122   :  { %2952 = vtanh.f32 %v400_v55  ;;  %v494_v58 = vadd.f32 %v488_v57, %v405_v53  ;;  %v507_v56 = vld [vmem:[#allocation4 + $0x10] sm:$0xff] }
 0x123   :  { %v397_v59 = vpop.f32.mrf.mxu0  ;;  %v2342_v60 = vpop.f32.mrf.mxu1  ;;  %v509_v61 = vunpack.c.l.bf16 %v507_v56 }
 0x124   :  { %v495_v19 = vmul.f32 0.5, %v494_v58  ;;  %v556_v59 = vrot.slane %v507_v56, 4 }
 0x125   :  { %v2323_v62 = vpop.f32.mrf.mxu0  ;;  %v491_v63 = vpop.f32.mrf.mxu1 }
 0x126   :  { %2954 = vtanh.f32 %v495_v19  ;;  %v558_v60 = vunpack.c.l.bf16 %v556_v59 }
 0x127   :  { %v2343_v35 = vpop.f32.mrf.mxu1 }
 0x128   :  { %v508_v35 = vld [vmem:[#allocation4 + $0x18] sm:$0xff] }
 0x129   :  { %v604_v36 = vunpack.c.l.bf16 %v508_v35  ;;  %v648_v37 = vrot.slane %v508_v35, 4 }
 0x12f   :  { %v2953_v40 = vpop.eup %2952 }
 0x130   :  { %v500_v42 = vmul.f32 %v2953_v40, %v213_v39 }
 0x132   :  { %v3385_v43 = vadd.f32 %v500_v42, %v499_v41  ;;  %v650_v41 = vunpack.c.l.bf16 %v648_v37 }
 0x133   :  { %v2955_v44 = vpop.eup %2954 }
 0x134   :  { %2956 = vtanh.f32 %v3385_v43  ;;  %v497_v45 = vmul.f32 0.5, %v2955_v44 }
 0x136   :  { %v498_v46 = vadd.f32 0.5, %v497_v45 }
 0x141   :  { %v2957_v47 = vpop.eup %2956 }
 0x142   :  { %v503_v48 = vmul.f32 %v2957_v47, %v498_v46 }
 0x144   :  { %v504_v49 = vpack.c.bf16 %v503_v48, %v503_v48 }
 0x146   :  { %505 = vst [vmem:[#allocation9] sm:$0xf] %v504_v49  ;;  %2361 = vmatmul.mubr.bf16.vlgmr.msra.gmra.mxu0 %v504_v49  ;;  %2381 = vmatmul.mubr.bf16.vlgmr.msra.gmra.mxu1 %v504_v49 }
 0x147   :  { %2385 = vmatpush3.bf16.msra.mxu0 %v3278_v17  ;;  %2405 = vmatpush3.bf16.msra.mxu1 %v3282_v18 }
 0x148   :  { %2386 = vmatprep.subr.bf16.mxu0 %v3172_v0  ;;  %2406 = vmatprep.subr.bf16.mxu1 %v3172_v0 }
 0x149   :  { %2400 = vmatprep.mubr.msk.bf16.mxu0 %vm3173_vm0, %v3172_v0  ;;  %2420 = vmatprep.mubr.msk.bf16.mxu1 %vm3173_vm0, %v3172_v0 }
 0x14b   :  { %2387 = vmatpush3.bf16.msra.mxu0 %v3286_v20  ;;  %2407 = vmatpush3.bf16.msra.mxu1 %v3292_v21 }
 0x14c   :  { %2388 = vmatprep.subr.bf16.mxu0 %v3172_v0  ;;  %2408 = vmatprep.subr.bf16.mxu1 %v3172_v0 }
 0x14f   :  { %2389 = vmatpush3.bf16.msra.mxu0 %v3298_v22  ;;  %2409 = vmatpush3.bf16.msra.mxu1 %v3302_v23 }
 0x150   :  { %2390 = vmatprep.subr.bf16.mxu0 %v3172_v0  ;;  %2410 = vmatprep.subr.bf16.mxu1 %v3172_v0 }
 0x153   :  { %2391 = vmatpush3.bf16.msra.mxu0 %v3306_v24  ;;  %2411 = vmatpush3.bf16.msra.mxu1 %v3310_v25 }
 0x154   :  { %2392 = vmatprep.subr.bf16.mxu0 %v3172_v0  ;;  %2412 = vmatprep.subr.bf16.mxu1 %v3172_v0 }
 0x157   :  { %2393 = vmatpush3.bf16.msra.mxu0 %v3314_v26  ;;  %2413 = vmatpush3.bf16.msra.mxu1 %v3318_v27 }
 0x158   :  { %2394 = vmatprep.subr.bf16.mxu0 %v3172_v0  ;;  %2414 = vmatprep.subr.bf16.mxu1 %v3172_v0 }
 0x15b   :  { %2395 = vmatpush3.bf16.msra.mxu0 %v3322_v28  ;;  %2415 = vmatpush3.bf16.msra.mxu1 %v3326_v29 }
 0x15c   :  { %2396 = vmatprep.subr.bf16.mxu0 %v3172_v0  ;;  %2416 = vmatprep.subr.bf16.mxu1 %v3172_v0 }
 0x15f   :  { %2397 = vmatpush3.bf16.msra.mxu0 %v3330_v30  ;;  %2417 = vmatpush3.bf16.msra.mxu1 %v3334_v31 }
 0x160   :  { %2398 = vmatprep.subr.bf16.mxu0 %v3172_v0  ;;  %2418 = vmatprep.subr.bf16.mxu1 %v3172_v0 }
 0x163   :  { %2399 = vmatpush3.bf16.msra.mxu0 %v3338_v32  ;;  %2419 = vmatpush3.bf16.msra.mxu1 %v3342_v33 }
 0x164   :  { %2424 = vmatprep.subr.bf16.mxu0 %v3172_v0  ;;  %2444 = vmatprep.subr.bf16.mxu1 %v3172_v0 }
 0x166   :  { %2401 = vmatmul.mubr.bf16.vlgmr.msra.gmra.mxu0 %v504_v49  ;;  %2421 = vmatmul.mubr.bf16.vlgmr.msra.gmra.mxu1 %v504_v49 }
 0x167   :  { %2425 = vmatpush3.bf16.msra.mxu0 %v3217_v1  ;;  %2445 = vmatpush3.bf16.msra.mxu1 %v3222_v3 }
 0x168   :  { %2426 = vmatprep.subr.bf16.mxu0 %v3172_v0  ;;  %2446 = vmatprep.subr.bf16.mxu1 %v3172_v0 }
 0x169   :  { %2440 = vmatprep.mubr.msk.bf16.mxu0 %vm3173_vm0, %v3172_v0  ;;  %2460 = vmatprep.mubr.msk.bf16.mxu1 %vm3173_vm0, %v3172_v0 }
 0x16b   :  { %2427 = vmatpush3.bf16.msra.mxu0 %v3219_v2  ;;  %2447 = vmatpush3.bf16.msra.mxu1 %v3226_v4 }
 0x16c   :  { %2428 = vmatprep.subr.bf16.mxu0 %v3172_v0  ;;  %2448 = vmatprep.subr.bf16.mxu1 %v3172_v0 }
 0x16f   :  { %2429 = vmatpush3.bf16.msra.mxu0 %v3230_v5  ;;  %2449 = vmatpush3.bf16.msra.mxu1 %v3234_v6 }
 0x170   :  { %2430 = vmatprep.subr.bf16.mxu0 %v3172_v0  ;;  %2450 = vmatprep.subr.bf16.mxu1 %v3172_v0 }
 0x173   :  { %2431 = vmatpush3.bf16.msra.mxu0 %v3238_v7  ;;  %2451 = vmatpush3.bf16.msra.mxu1 %v3242_v8 }
 0x174   :  { %2432 = vmatprep.subr.bf16.mxu0 %v3172_v0  ;;  %2452 = vmatprep.subr.bf16.mxu1 %v3172_v0 }
 0x177   :  { %2433 = vmatpush3.bf16.msra.mxu0 %v3246_v9  ;;  %2453 = vmatpush3.bf16.msra.mxu1 %v3250_v10 }
 0x178   :  { %2434 = vmatprep.subr.bf16.mxu0 %v3172_v0  ;;  %2454 = vmatprep.subr.bf16.mxu1 %v3172_v0 }
 0x17b   :  { %2435 = vmatpush3.bf16.msra.mxu0 %v3254_v11  ;;  %2455 = vmatpush3.bf16.msra.mxu1 %v3258_v12 }
 0x17c   :  { %2436 = vmatprep.subr.bf16.mxu0 %v3172_v0  ;;  %2456 = vmatprep.subr.bf16.mxu1 %v3172_v0 }
 0x17f   :  { %2437 = vmatpush3.bf16.msra.mxu0 %v3262_v13  ;;  %2457 = vmatpush3.bf16.msra.mxu1 %v3266_v14 }
 0x180   :  { %2438 = vmatprep.subr.bf16.mxu0 %v3172_v0  ;;  %2458 = vmatprep.subr.bf16.mxu1 %v3172_v0 }
 0x183   :  { %2439 = vmatpush3.bf16.msra.mxu0 %v3270_v15  ;;  %2459 = vmatpush3.bf16.msra.mxu1 %v3274_v16 }
 0x184   :  { %2464 = vmatprep.subr.bf16.mxu0 %v3172_v0  ;;  %2484 = vmatprep.subr.bf16.mxu1 %v3172_v0 }
 0x206   :  { %v544_v50 = vpop.f32.mrf.mxu0  ;;  %v593_v51 = vpop.f32.mrf.mxu1 }
 0x207   :  { %v599_v62 = vadd.f32 %v593_v51, %v558_v60  ;;  %v550_v63 = vadd.f32 %v544_v50, %v509_v61 }
 0x208   :  { %v2362_v52 = vpop.f32.mrf.mxu0  ;;  %v2382_v53 = vpop.f32.mrf.mxu1 }
 0x209   :  { %v600_v19 = vmul.f32 0.5, %v599_v62  ;;  %v551_v34 = vmul.f32 0.5, %v550_v63 }
 0x20a   :  { %v547_v54 = vpop.f32.mrf.mxu0  ;;  %v596_v55 = vpop.f32.mrf.mxu1 }
 0x20b   :  { %2958 = vtanh.f32 %v600_v19 }
 0x20c   :  { %v2363_v57 = vpop.f32.mrf.mxu0  ;;  %v2383_v58 = vpop.f32.mrf.mxu1  ;;  %2960 = vtanh.f32 %v551_v34 }
 0x218   :  { %v2959_v48 = vpop.eup %2958 }
 0x219   :  { %v2961_v51 = vpop.eup %2960  ;;  %v602_v52 = vmul.f32 0.5, %v2959_v48 }
 0x21a   :  { %v553_v54 = vmul.f32 0.5, %v2961_v51 }
 0x21b   :  { %v603_v55 = vadd.f32 0.5, %v602_v52 }
 0x21c   :  { %v554_v56 = vadd.f32 0.5, %v553_v54 }
 0x21d   :  { %v696_v58 = vmul.f32 %v603_v55, %v3385_v43 }
 0x226   :  { %v639_v38 = vpop.f32.mrf.mxu0  ;;  %v685_v39 = vpop.f32.mrf.mxu1 }
 0x227   :  { %v645_v40 = vadd.f32 %v639_v38, %v604_v36  ;;  %v691_v47 = vadd.f32 %v685_v39, %v650_v41 }
 0x228   :  { %v2402_v42 = vpop.f32.mrf.mxu0  ;;  %v2422_v44 = vpop.f32.mrf.mxu1 }
 0x229   :  { %2962 = vtanh.f32 %v645_v40  ;;  %v692_v53 = vmul.f32 0.5, %v691_v47  ;;  %v706_v44 = vld [vmem:[#allocation4 + $0x28] sm:$0xff] }
 0x22a   :  { %v642_v45 = vpop.f32.mrf.mxu0  ;;  %v688_v46 = vpop.f32.mrf.mxu1 }
 0x22b   :  { %2964 = vtanh.f32 %v692_v53  ;;  %v802_v45 = vunpack.c.l.bf16 %v706_v44  ;;  %v846_v46 = vrot.slane %v706_v44, 4 }
 0x22c   :  { %v2403_v49 = vpop.f32.mrf.mxu0  ;;  %v2423_v50 = vpop.f32.mrf.mxu1 }
 0x22d   :  { %v848_v50 = vunpack.c.l.bf16 %v846_v46 }
 0x236   :  { %v2963_v57 = vpop.eup %2962 }
 0x237   :  { %v697_v59 = vmul.f32 %v2963_v57, %v554_v56 }
 0x238   :  { %v2965_v61 = vpop.eup %2964 }
 0x239   :  { %v3461_v60 = vadd.f32 %v697_v59, %v696_v58  ;;  %v694_v62 = vmul.f32 0.5, %v2965_v61 }
 0x23b   :  { %2966 = vtanh.f32 %v3461_v60  ;;  %v695_v63 = vadd.f32 0.5, %v694_v62 }
 0x248   :  { %v2967_v19 = vpop.eup %2966 }
 0x249   :  { %v700_v34 = vmul.f32 %v2967_v19, %v695_v63 }
 0x24b   :  { %v701_v35 = vpack.c.bf16 %v700_v34, %v700_v34 }
 0x24d   :  { %703 = vst [vmem:[#allocation9 + $0x4] sm:$0xf] %v701_v35  ;;  %2441 = vmatmul.mubr.bf16.vlgmr.msra.gmra.mxu0 %v701_v35  ;;  %2461 = vmatmul.mubr.bf16.vlgmr.msra.gmra.mxu1 %v701_v35 }
 0x24e   :  { %2465 = vmatpush3.bf16.msra.mxu0 %v3278_v17  ;;  %2485 = vmatpush3.bf16.msra.mxu1 %v3282_v18 }
 0x24f   :  { %2466 = vmatprep.subr.bf16.mxu0 %v3172_v0  ;;  %2486 = vmatprep.subr.bf16.mxu1 %v3172_v0 }
 0x250   :  { %2480 = vmatprep.mubr.msk.bf16.mxu0 %vm3173_vm0, %v3172_v0  ;;  %2500 = vmatprep.mubr.msk.bf16.mxu1 %vm3173_vm0, %v3172_v0 }
 0x252   :  { %2467 = vmatpush3.bf16.msra.mxu0 %v3286_v20  ;;  %2487 = vmatpush3.bf16.msra.mxu1 %v3292_v21 }
 0x253   :  { %2468 = vmatprep.subr.bf16.mxu0 %v3172_v0  ;;  %2488 = vmatprep.subr.bf16.mxu1 %v3172_v0 }
 0x256   :  { %2469 = vmatpush3.bf16.msra.mxu0 %v3298_v22  ;;  %2489 = vmatpush3.bf16.msra.mxu1 %v3302_v23 }
 0x257   :  { %2470 = vmatprep.subr.bf16.mxu0 %v3172_v0  ;;  %2490 = vmatprep.subr.bf16.mxu1 %v3172_v0 }
 0x25a   :  { %2471 = vmatpush3.bf16.msra.mxu0 %v3306_v24  ;;  %2491 = vmatpush3.bf16.msra.mxu1 %v3310_v25 }
 0x25b   :  { %2472 = vmatprep.subr.bf16.mxu0 %v3172_v0  ;;  %2492 = vmatprep.subr.bf16.mxu1 %v3172_v0 }
 0x25e   :  { %2473 = vmatpush3.bf16.msra.mxu0 %v3314_v26  ;;  %2493 = vmatpush3.bf16.msra.mxu1 %v3318_v27 }
 0x25f   :  { %2474 = vmatprep.subr.bf16.mxu0 %v3172_v0  ;;  %2494 = vmatprep.subr.bf16.mxu1 %v3172_v0 }
 0x262   :  { %2475 = vmatpush3.bf16.msra.mxu0 %v3322_v28  ;;  %2495 = vmatpush3.bf16.msra.mxu1 %v3326_v29 }
 0x263   :  { %2476 = vmatprep.subr.bf16.mxu0 %v3172_v0  ;;  %2496 = vmatprep.subr.bf16.mxu1 %v3172_v0 }
 0x266   :  { %2477 = vmatpush3.bf16.msra.mxu0 %v3330_v30  ;;  %2497 = vmatpush3.bf16.msra.mxu1 %v3334_v31 }
 0x267   :  { %2478 = vmatprep.subr.bf16.mxu0 %v3172_v0  ;;  %2498 = vmatprep.subr.bf16.mxu1 %v3172_v0 }
 0x26a   :  { %2479 = vmatpush3.bf16.msra.mxu0 %v3338_v32  ;;  %2499 = vmatpush3.bf16.msra.mxu1 %v3342_v33 }
 0x26b   :  { %2504 = vmatprep.subr.bf16.mxu0 %v3172_v0  ;;  %2524 = vmatprep.subr.bf16.mxu1 %v3172_v0 }
 0x26d   :  { %2481 = vmatmul.mubr.bf16.vlgmr.msra.gmra.mxu0 %v701_v35  ;;  %2501 = vmatmul.mubr.bf16.vlgmr.msra.gmra.mxu1 %v701_v35 }
 0x26e   :  { %2505 = vmatpush3.bf16.msra.mxu0 %v3217_v1  ;;  %2525 = vmatpush3.bf16.msra.mxu1 %v3222_v3 }
 0x26f   :  { %2506 = vmatprep.subr.bf16.mxu0 %v3172_v0  ;;  %2526 = vmatprep.subr.bf16.mxu1 %v3172_v0 }
 0x270   :  { %2520 = vmatprep.mubr.msk.bf16.mxu0 %vm3173_vm0, %v3172_v0  ;;  %2540 = vmatprep.mubr.msk.bf16.mxu1 %vm3173_vm0, %v3172_v0 }
 0x272   :  { %2507 = vmatpush3.bf16.msra.mxu0 %v3219_v2  ;;  %2527 = vmatpush3.bf16.msra.mxu1 %v3226_v4 }
 0x273   :  { %2508 = vmatprep.subr.bf16.mxu0 %v3172_v0  ;;  %2528 = vmatprep.subr.bf16.mxu1 %v3172_v0 }
 0x276   :  { %2509 = vmatpush3.bf16.msra.mxu0 %v3230_v5  ;;  %2529 = vmatpush3.bf16.msra.mxu1 %v3234_v6 }
 0x277   :  { %2510 = vmatprep.subr.bf16.mxu0 %v3172_v0  ;;  %2530 = vmatprep.subr.bf16.mxu1 %v3172_v0 }
 0x27a   :  { %2511 = vmatpush3.bf16.msra.mxu0 %v3238_v7  ;;  %2531 = vmatpush3.bf16.msra.mxu1 %v3242_v8  ;;  %v705_v7 = vld [vmem:[#allocation4 + $0x20] sm:$0xff] }
 0x27b   :  { %2512 = vmatprep.subr.bf16.mxu0 %v3172_v0  ;;  %2532 = vmatprep.subr.bf16.mxu1 %v3172_v0  ;;  %v754_v36 = vrot.slane %v705_v7, 4  ;;  %v707_v38 = vunpack.c.l.bf16 %v705_v7 }
 0x27d   :  { %v756_v37 = vunpack.c.l.bf16 %v754_v36 }
 0x27e   :  { %2513 = vmatpush3.bf16.msra.mxu0 %v3246_v9  ;;  %2533 = vmatpush3.bf16.msra.mxu1 %v3250_v10 }
 0x27f   :  { %2514 = vmatprep.subr.bf16.mxu0 %v3172_v0  ;;  %2534 = vmatprep.subr.bf16.mxu1 %v3172_v0 }
 0x282   :  { %2515 = vmatpush3.bf16.msra.mxu0 %v3254_v11  ;;  %2535 = vmatpush3.bf16.msra.mxu1 %v3258_v12 }
 0x283   :  { %2516 = vmatprep.subr.bf16.mxu0 %v3172_v0  ;;  %2536 = vmatprep.subr.bf16.mxu1 %v3172_v0 }
 0x286   :  { %2517 = vmatpush3.bf16.msra.mxu0 %v3262_v13  ;;  %2537 = vmatpush3.bf16.msra.mxu1 %v3266_v14 }
 0x287   :  { %2518 = vmatprep.subr.bf16.mxu0 %v3172_v0  ;;  %2538 = vmatprep.subr.bf16.mxu1 %v3172_v0 }
 0x28a   :  { %2519 = vmatpush3.bf16.msra.mxu0 %v3270_v15  ;;  %2539 = vmatpush3.bf16.msra.mxu1 %v3274_v16 }
 0x28b   :  { %2544 = vmatprep.subr.bf16.mxu0 %v3172_v0  ;;  %2564 = vmatprep.subr.bf16.mxu1 %v3172_v0 }
 0x30d   :  { %v742_v1 = vpop.f32.mrf.mxu0  ;;  %v791_v2 = vpop.f32.mrf.mxu1 }
 0x30e   :  { %v797_v39 = vadd.f32 %v791_v2, %v756_v37  ;;  %v748_v40 = vadd.f32 %v742_v1, %v707_v38  ;;  %v903_v37 = vld [vmem:[#allocation4 + $0x30] sm:$0xff] }
 0x30f   :  { %v2442_v3 = vpop.f32.mrf.mxu0  ;;  %v2462_v4 = vpop.f32.mrf.mxu1 }
 0x310   :  { %v798_v41 = vmul.f32 0.5, %v797_v39  ;;  %v749_v42 = vmul.f32 0.5, %v748_v40  ;;  %v952_v39 = vrot.slane %v903_v37, 4 }
 0x311   :  { %v745_v5 = vpop.f32.mrf.mxu0  ;;  %v794_v6 = vpop.f32.mrf.mxu1 }
 0x312   :  { %2968 = vtanh.f32 %v798_v41  ;;  %v954_v40 = vunpack.c.l.bf16 %v952_v39  ;;  %v905_v41 = vunpack.c.l.bf16 %v903_v37  ;;  %v3655_v37 = vld [vmem:[#allocation7 + $0xac] ss:$16 sps:$4 sm:$0xff]  }
 0x313   :  { %v2443_v8 = vpop.f32.mrf.mxu0  ;;  %v2463_v43 = vpop.f32.mrf.mxu1  ;;  %2970 = vtanh.f32 %v749_v42 }
 0x31f   :  { %v2969_v56 = vpop.eup %2968 }
 0x320   :  { %v2971_v59 = vpop.eup %2970  ;;  %v800_v61 = vmul.f32 0.5, %v2969_v56 }
 0x321   :  { %v751_v63 = vmul.f32 0.5, %v2971_v59 }
 0x322   :  { %v801_v19 = vadd.f32 0.5, %v800_v61 }
 0x323   :  { %v752_v34 = vadd.f32 0.5, %v751_v63 }
 0x324   :  { %v894_v1 = vmul.f32 %v801_v19, %v3461_v60  ;;  %v3607_v60 = vld [vmem:[#allocation7 + $0x84] ss:$16 sps:$4 sm:$0xff]  }
 0x32d   :  { %v837_v47 = vpop.f32.mrf.mxu0  ;;  %v883_v48 = vpop.f32.mrf.mxu1 }
 0x32e   :  { %v843_v49 = vadd.f32 %v837_v47, %v802_v45  ;;  %v889_v55 = vadd.f32 %v883_v48, %v848_v50  ;;  %v904_v45 = vld [vmem:[#allocation4 + $0x38] sm:$0xff] }
 0x32f   :  { %v2482_v51 = vpop.f32.mrf.mxu0  ;;  %v2502_v52 = vpop.f32.mrf.mxu1  ;;  %v1000_v46 = vunpack.c.l.bf16 %v904_v45  ;;  %v1044_v47 = vrot.slane %v904_v45, 4 }
 0x330   :  { %2972 = vtanh.f32 %v843_v49  ;;  %v890_v62 = vmul.f32 0.5, %v889_v55 }
 0x331   :  { %v840_v53 = vpop.f32.mrf.mxu0  ;;  %v886_v54 = vpop.f32.mrf.mxu1  ;;  %v1046_v51 = vunpack.c.l.bf16 %v1044_v47 }
 0x332   :  { %2974 = vtanh.f32 %v890_v62 }
 0x333   :  { %v2483_v57 = vpop.f32.mrf.mxu0  ;;  %v2503_v58 = vpop.f32.mrf.mxu1 }
 0x33d   :  { %v2973_v35 = vpop.eup %2972 }
 0x33e   :  { %v895_v2 = vmul.f32 %v2973_v35, %v752_v34 }
 0x33f   :  { %v2975_v4 = vpop.eup %2974 }
 0x340   :  { %v3537_v3 = vadd.f32 %v895_v2, %v894_v1  ;;  %v892_v5 = vmul.f32 0.5, %v2975_v4 }
 0x342   :  { %2976 = vtanh.f32 %v3537_v3  ;;  %v893_v6 = vadd.f32 0.5, %v892_v5 }
 0x34f   :  { %v2977_v7 = vpop.eup %2976 }
 0x350   :  { %v898_v8 = vmul.f32 %v2977_v7, %v893_v6 }
 0x352   :  { %v899_v43 = vpack.c.bf16 %v898_v8, %v898_v8 }
 0x354   :  { %901 = vst [vmem:[#allocation9 + $0x8] sm:$0xf] %v899_v43  ;;  %2521 = vmatmul.mubr.bf16.vlgmr.msra.gmra.mxu0 %v899_v43  ;;  %2541 = vmatmul.mubr.bf16.vlgmr.msra.gmra.mxu1 %v899_v43 }
 0x355   :  { %2545 = vmatpush3.bf16.msra.mxu0 %v3278_v17  ;;  %2565 = vmatpush3.bf16.msra.mxu1 %v3282_v18  ;;  %v3576_v17 = vld [vmem:[#allocation7 + $0xe0] ss:$16 sps:$4 sm:$0xff]   ;;  %v3579_v18 = vld [vmem:[#allocation7 + $0xe4] ss:$16 sps:$4 sm:$0xff]  }
 0x356   :  { %2546 = vmatprep.subr.bf16.mxu0 %v3172_v0  ;;  %2566 = vmatprep.subr.bf16.mxu1 %v3172_v0 }
 0x357   :  { %2560 = vmatprep.mubr.msk.bf16.mxu0 %vm3173_vm0, %v3172_v0  ;;  %2580 = vmatprep.mubr.msk.bf16.mxu1 %vm3173_vm0, %v3172_v0 }
 0x359   :  { %2547 = vmatpush3.bf16.msra.mxu0 %v3286_v20  ;;  %2567 = vmatpush3.bf16.msra.mxu1 %v3292_v21  ;;  %v3588_v20 = vld [vmem:[#allocation7 + $0xc0] ss:$16 sps:$4 sm:$0xff]   ;;  %v3591_v21 = vld [vmem:[#allocation7 + $0xc4] ss:$16 sps:$4 sm:$0xff]  }
 0x35a   :  { %2548 = vmatprep.subr.bf16.mxu0 %v3172_v0  ;;  %2568 = vmatprep.subr.bf16.mxu1 %v3172_v0 }
 0x35d   :  { %2549 = vmatpush3.bf16.msra.mxu0 %v3298_v22  ;;  %2569 = vmatpush3.bf16.msra.mxu1 %v3302_v23  ;;  %v3596_v22 = vld [vmem:[#allocation7 + $0xa0] ss:$16 sps:$4 sm:$0xff]   ;;  %v3599_v23 = vld [vmem:[#allocation7 + $0xa4] ss:$16 sps:$4 sm:$0xff]  }
 0x35e   :  { %2550 = vmatprep.subr.bf16.mxu0 %v3172_v0  ;;  %2570 = vmatprep.subr.bf16.mxu1 %v3172_v0 }
 0x361   :  { %2551 = vmatpush3.bf16.msra.mxu0 %v3306_v24  ;;  %2571 = vmatpush3.bf16.msra.mxu1 %v3310_v25  ;;  %v3604_v24 = vld [vmem:[#allocation7 + $0x80] ss:$16 sps:$4 sm:$0xff]  }
 0x362   :  { %2552 = vmatprep.subr.bf16.mxu0 %v3172_v0  ;;  %2572 = vmatprep.subr.bf16.mxu1 %v3172_v0 }
 0x365   :  { %2553 = vmatpush3.bf16.msra.mxu0 %v3314_v26  ;;  %2573 = vmatpush3.bf16.msra.mxu1 %v3318_v27 }
 0x366   :  { %2554 = vmatprep.subr.bf16.mxu0 %v3172_v0  ;;  %2574 = vmatprep.subr.bf16.mxu1 %v3172_v0 }
 0x369   :  { %2555 = vmatpush3.bf16.msra.mxu0 %v3322_v28  ;;  %2575 = vmatpush3.bf16.msra.mxu1 %v3326_v29 }
 0x36a   :  { %2556 = vmatprep.subr.bf16.mxu0 %v3172_v0  ;;  %2576 = vmatprep.subr.bf16.mxu1 %v3172_v0 }
 0x36d   :  { %2557 = vmatpush3.bf16.msra.mxu0 %v3330_v30  ;;  %2577 = vmatpush3.bf16.msra.mxu1 %v3334_v31 }
 0x36e   :  { %2558 = vmatprep.subr.bf16.mxu0 %v3172_v0  ;;  %2578 = vmatprep.subr.bf16.mxu1 %v3172_v0 }
 0x371   :  { %2559 = vmatpush3.bf16.msra.mxu0 %v3338_v32  ;;  %2579 = vmatpush3.bf16.msra.mxu1 %v3342_v33 }
 0x372   :  { %2584 = vmatprep.subr.bf16.mxu0 %v3172_v0  ;;  %2604 = vmatprep.subr.bf16.mxu1 %v3172_v0 }
 0x374   :  { %2561 = vmatmul.mubr.bf16.vlgmr.msra.gmra.mxu0 %v899_v43  ;;  %2581 = vmatmul.mubr.bf16.vlgmr.msra.gmra.mxu1 %v899_v43 }
 0x375   :  { %2585 = vmatpush3.bf16.msra.mxu0 %v3576_v17  ;;  %2605 = vmatpush3.bf16.msra.mxu1 %v3579_v18 }
 0x376   :  { %2586 = vmatprep.subr.bf16.mxu0 %v3172_v0  ;;  %2606 = vmatprep.subr.bf16.mxu1 %v3172_v0 }
 0x377   :  { %2600 = vmatprep.mubr.msk.bf16.mxu0 %vm3173_vm0, %v3172_v0  ;;  %2620 = vmatprep.mubr.msk.bf16.mxu1 %vm3173_vm0, %v3172_v0 }
 0x379   :  { %2587 = vmatpush3.bf16.msra.mxu0 %v3588_v20  ;;  %2607 = vmatpush3.bf16.msra.mxu1 %v3591_v21 }
 0x37a   :  { %2588 = vmatprep.subr.bf16.mxu0 %v3172_v0  ;;  %2608 = vmatprep.subr.bf16.mxu1 %v3172_v0 }
 0x37d   :  { %2589 = vmatpush3.bf16.msra.mxu0 %v3596_v22  ;;  %2609 = vmatpush3.bf16.msra.mxu1 %v3599_v23 }
 0x37e   :  { %2590 = vmatprep.subr.bf16.mxu0 %v3172_v0  ;;  %2610 = vmatprep.subr.bf16.mxu1 %v3172_v0 }
 0x381   :  { %2591 = vmatpush3.bf16.msra.mxu0 %v3604_v24  ;;  %2611 = vmatpush3.bf16.msra.mxu1 %v3607_v60 }
 0x382   :  { %2592 = vmatprep.subr.bf16.mxu0 %v3172_v0  ;;  %2612 = vmatprep.subr.bf16.mxu1 %v3172_v0 }
 0x385   :  { %2593 = vmatpush3.bf16.msra.mxu0 %v3246_v9  ;;  %2613 = vmatpush3.bf16.msra.mxu1 %v3250_v10 }
 0x386   :  { %2594 = vmatprep.subr.bf16.mxu0 %v3172_v0  ;;  %2614 = vmatprep.subr.bf16.mxu1 %v3172_v0 }
 0x389   :  { %2595 = vmatpush3.bf16.msra.mxu0 %v3254_v11  ;;  %2615 = vmatpush3.bf16.msra.mxu1 %v3258_v12 }
 0x38a   :  { %2596 = vmatprep.subr.bf16.mxu0 %v3172_v0  ;;  %2616 = vmatprep.subr.bf16.mxu1 %v3172_v0 }
 0x38d   :  { %2597 = vmatpush3.bf16.msra.mxu0 %v3262_v13  ;;  %2617 = vmatpush3.bf16.msra.mxu1 %v3266_v14 }
 0x38e   :  { %2598 = vmatprep.subr.bf16.mxu0 %v3172_v0  ;;  %2618 = vmatprep.subr.bf16.mxu1 %v3172_v0 }
 0x391   :  { %2599 = vmatpush3.bf16.msra.mxu0 %v3270_v15  ;;  %2619 = vmatpush3.bf16.msra.mxu1 %v3274_v16 }
 0x392   :  { %2624 = vmatprep.subr.bf16.mxu0 %v3172_v0  ;;  %2644 = vmatprep.subr.bf16.mxu1 %v3172_v0 }
 0x414   :  { %v940_v9 = vpop.f32.mrf.mxu0  ;;  %v989_v10 = vpop.f32.mrf.mxu1 }
 0x415   :  { %v995_v42 = vadd.f32 %v989_v10, %v954_v40  ;;  %v946_v15 = vadd.f32 %v940_v9, %v905_v41 }
 0x416   :  { %v2522_v11 = vpop.f32.mrf.mxu0  ;;  %v2542_v12 = vpop.f32.mrf.mxu1 }
 0x417   :  { %v996_v44 = vmul.f32 0.5, %v995_v42  ;;  %v947_v16 = vmul.f32 0.5, %v946_v15  ;;  %v3632_v11 = vld [vmem:[#allocation7 + $0xe8] ss:$16 sps:$4 sm:$0xff]   ;;  %v3635_v12 = vld [vmem:[#allocation7 + $0xec] ss:$16 sps:$4 sm:$0xff]  }
 0x418   :  { %v943_v36 = vpop.f32.mrf.mxu0  ;;  %v992_v13 = vpop.f32.mrf.mxu1  ;;  %v1101_v15 = vld [vmem:[#allocation4 + $0x40] sm:$0xff] }
 0x419   :  { %2978 = vtanh.f32 %v996_v44  ;;  %v3647_v36 = vld [vmem:[#allocation7 + $0xcc] ss:$16 sps:$4 sm:$0xff]   ;;  %v3652_v13 = vld [vmem:[#allocation7 + $0xa8] ss:$16 sps:$4 sm:$0xff]   ;;  %v1150_v45 = vrot.slane %v1101_v15, 4  ;;  %v1103_v47 = vunpack.c.l.bf16 %v1101_v15 }
 0x41a   :  { %v2523_v14 = vpop.f32.mrf.mxu0  ;;  %v2543_v38 = vpop.f32.mrf.mxu1  ;;  %2980 = vtanh.f32 %v947_v16 }
 0x41b   :  { %v3660_v14 = vld [vmem:[#allocation7 + $0x88] ss:$16 sps:$4 sm:$0xff]  }
 0x426   :  { %v2979_v57 = vpop.eup %2978 }
 0x427   :  { %v2981_v61 = vpop.eup %2980  ;;  %v998_v62 = vmul.f32 0.5, %v2979_v57 }
 0x428   :  { %v949_v19 = vmul.f32 0.5, %v2981_v61 }
 0x429   :  { %v999_v34 = vadd.f32 0.5, %v998_v62 }
 0x42a   :  { %v950_v35 = vadd.f32 0.5, %v949_v19 }
 0x42b   :  { %v1092_v2 = vmul.f32 %v999_v34, %v3537_v3  ;;  %v3644_v3 = vld [vmem:[#allocation7 + $0xc8] ss:$16 sps:$4 sm:$0xff]  }
 0x434   :  { %v1035_v48 = vpop.f32.mrf.mxu0  ;;  %v1081_v49 = vpop.f32.mrf.mxu1 }
 0x435   :  { %v1041_v50 = vadd.f32 %v1035_v48, %v1000_v46  ;;  %v1087_v56 = vadd.f32 %v1081_v49, %v1046_v51  ;;  %v1152_v46 = vunpack.c.l.bf16 %v1150_v45  ;;  %v3763_v45 = vld [vmem:[#allocation7 + $0x6c] ss:$16 sps:$4 sm:$0xff]  }
 0x436   :  { %v2562_v52 = vpop.f32.mrf.mxu0  ;;  %v2582_v53 = vpop.f32.mrf.mxu1 }
 0x437   :  { %2982 = vtanh.f32 %v1041_v50  ;;  %v1088_v63 = vmul.f32 0.5, %v1087_v56  ;;  %v1102_v52 = vld [vmem:[#allocation4 + $0x48] sm:$0xff] }
 0x438   :  { %v1038_v54 = vpop.f32.mrf.mxu0  ;;  %v1084_v55 = vpop.f32.mrf.mxu1  ;;  %v1198_v53 = vunpack.c.l.bf16 %v1102_v52 }
 0x439   :  { %2984 = vtanh.f32 %v1088_v63  ;;  %v1242_v54 = vrot.slane %v1102_v52, 4 }
 0x43a   :  { %v2563_v58 = vpop.f32.mrf.mxu0  ;;  %v2583_v59 = vpop.f32.mrf.mxu1 }
 0x43b   :  { %v1244_v58 = vunpack.c.l.bf16 %v1242_v54 }
 0x444   :  { %v2983_v1 = vpop.eup %2982 }
 0x445   :  { %v1093_v4 = vmul.f32 %v2983_v1, %v950_v35 }
 0x446   :  { %v2985_v6 = vpop.eup %2984 }
 0x447   :  { %v3629_v5 = vadd.f32 %v1093_v4, %v1092_v2  ;;  %v1090_v7 = vmul.f32 0.5, %v2985_v6 }
 0x449   :  { %2986 = vtanh.f32 %v3629_v5  ;;  %v1091_v8 = vadd.f32 0.5, %v1090_v7 }
 0x456   :  { %v2987_v43 = vpop.eup %2986 }
 0x457   :  { %v1096_v9 = vmul.f32 %v2987_v43, %v1091_v8 }
 0x459   :  { %v1097_v10 = vpack.c.bf16 %v1096_v9, %v1096_v9 }
 0x45b   :  { %1099 = vst [vmem:[#allocation9 + $0xc] sm:$0xf] %v1097_v10  ;;  %2601 = vmatmul.mubr.bf16.vlgmr.msra.gmra.mxu0 %v1097_v10  ;;  %2621 = vmatmul.mubr.bf16.vlgmr.msra.gmra.mxu1 %v1097_v10 }
 0x45c   :  { %2625 = vmatpush3.bf16.msra.mxu0 %v3632_v11  ;;  %2645 = vmatpush3.bf16.msra.mxu1 %v3635_v12 }
 0x45d   :  { %2626 = vmatprep.subr.bf16.mxu0 %v3172_v0  ;;  %2646 = vmatprep.subr.bf16.mxu1 %v3172_v0 }
 0x45e   :  { %2640 = vmatprep.mubr.msk.bf16.mxu0 %vm3173_vm0, %v3172_v0  ;;  %2660 = vmatprep.mubr.msk.bf16.mxu1 %vm3173_vm0, %v3172_v0 }
 0x460   :  { %2627 = vmatpush3.bf16.msra.mxu0 %v3644_v3  ;;  %2647 = vmatpush3.bf16.msra.mxu1 %v3647_v36 }
 0x461   :  { %2628 = vmatprep.subr.bf16.mxu0 %v3172_v0  ;;  %2648 = vmatprep.subr.bf16.mxu1 %v3172_v0 }
 0x464   :  { %2629 = vmatpush3.bf16.msra.mxu0 %v3652_v13  ;;  %2649 = vmatpush3.bf16.msra.mxu1 %v3655_v37 }
 0x465   :  { %2630 = vmatprep.subr.bf16.mxu0 %v3172_v0  ;;  %2650 = vmatprep.subr.bf16.mxu1 %v3172_v0 }
 0x468   :  { %2631 = vmatpush3.bf16.msra.mxu0 %v3660_v14  ;;  %2651 = vmatpush3.bf16.msra.mxu1 %v3310_v25  ;;  %v3702_v25 = vld [vmem:[#allocation7 + $0x60] ss:$16 sps:$4 sm:$0xff]  }
 0x469   :  { %2632 = vmatprep.subr.bf16.mxu0 %v3172_v0  ;;  %2652 = vmatprep.subr.bf16.mxu1 %v3172_v0 }
 0x46c   :  { %2633 = vmatpush3.bf16.msra.mxu0 %v3314_v26  ;;  %2653 = vmatpush3.bf16.msra.mxu1 %v3318_v27  ;;  %v3705_v26 = vld [vmem:[#allocation7 + $0x64] ss:$16 sps:$4 sm:$0xff]   ;;  %v3710_v27 = vld [vmem:[#allocation7 + $0x40] ss:$16 sps:$4 sm:$0xff]  }
 0x46d   :  { %2634 = vmatprep.subr.bf16.mxu0 %v3172_v0  ;;  %2654 = vmatprep.subr.bf16.mxu1 %v3172_v0 }
 0x470   :  { %2635 = vmatpush3.bf16.msra.mxu0 %v3322_v28  ;;  %2655 = vmatpush3.bf16.msra.mxu1 %v3326_v29  ;;  %v3713_v28 = vld [vmem:[#allocation7 + $0x44] ss:$16 sps:$4 sm:$0xff]   ;;  %v3718_v29 = vld [vmem:[#allocation7 + $0x20] ss:$16 sps:$4 sm:$0xff]  }
 0x471   :  { %2636 = vmatprep.subr.bf16.mxu0 %v3172_v0  ;;  %2656 = vmatprep.subr.bf16.mxu1 %v3172_v0 }
 0x474   :  { %2637 = vmatpush3.bf16.msra.mxu0 %v3330_v30  ;;  %2657 = vmatpush3.bf16.msra.mxu1 %v3334_v31  ;;  %v3721_v30 = vld [vmem:[#allocation7 + $0x24] ss:$16 sps:$4 sm:$0xff]   ;;  %v3726_v31 = vld [vmem:[#allocation7] ss:$16 sps:$4 sm:$0xff]  }
 0x475   :  { %2638 = vmatprep.subr.bf16.mxu0 %v3172_v0  ;;  %2658 = vmatprep.subr.bf16.mxu1 %v3172_v0 }
 0x478   :  { %2639 = vmatpush3.bf16.msra.mxu0 %v3338_v32  ;;  %2659 = vmatpush3.bf16.msra.mxu1 %v3342_v33  ;;  %v3729_v32 = vld [vmem:[#allocation7 + $0x4] ss:$16 sps:$4 sm:$0xff]  }
 0x479   :  { %2664 = vmatprep.subr.bf16.mxu0 %v3172_v0  ;;  %2684 = vmatprep.subr.bf16.mxu1 %v3172_v0 }
 0x47b   :  { %2641 = vmatmul.mubr.bf16.vlgmr.msra.gmra.mxu0 %v1097_v10  ;;  %2661 = vmatmul.mubr.bf16.vlgmr.msra.gmra.mxu1 %v1097_v10 }
 0x47c   :  { %2665 = vmatpush3.bf16.msra.mxu0 %v3576_v17  ;;  %2685 = vmatpush3.bf16.msra.mxu1 %v3579_v18 }
 0x47d   :  { %2666 = vmatprep.subr.bf16.mxu0 %v3172_v0  ;;  %2686 = vmatprep.subr.bf16.mxu1 %v3172_v0 }
 0x47e   :  { %2680 = vmatprep.mubr.msk.bf16.mxu0 %vm3173_vm0, %v3172_v0  ;;  %2700 = vmatprep.mubr.msk.bf16.mxu1 %vm3173_vm0, %v3172_v0 }
 0x480   :  { %2667 = vmatpush3.bf16.msra.mxu0 %v3588_v20  ;;  %2687 = vmatpush3.bf16.msra.mxu1 %v3591_v21 }
 0x481   :  { %2668 = vmatprep.subr.bf16.mxu0 %v3172_v0  ;;  %2688 = vmatprep.subr.bf16.mxu1 %v3172_v0 }
 0x484   :  { %2669 = vmatpush3.bf16.msra.mxu0 %v3596_v22  ;;  %2689 = vmatpush3.bf16.msra.mxu1 %v3599_v23 }
 0x485   :  { %2670 = vmatprep.subr.bf16.mxu0 %v3172_v0  ;;  %2690 = vmatprep.subr.bf16.mxu1 %v3172_v0 }
 0x488   :  { %2671 = vmatpush3.bf16.msra.mxu0 %v3604_v24  ;;  %2691 = vmatpush3.bf16.msra.mxu1 %v3607_v60 }
 0x489   :  { %2672 = vmatprep.subr.bf16.mxu0 %v3172_v0  ;;  %2692 = vmatprep.subr.bf16.mxu1 %v3172_v0 }
 0x48c   :  { %2673 = vmatpush3.bf16.msra.mxu0 %v3702_v25  ;;  %2693 = vmatpush3.bf16.msra.mxu1 %v3705_v26 }
 0x48d   :  { %2674 = vmatprep.subr.bf16.mxu0 %v3172_v0  ;;  %2694 = vmatprep.subr.bf16.mxu1 %v3172_v0 }
 0x490   :  { %2675 = vmatpush3.bf16.msra.mxu0 %v3710_v27  ;;  %2695 = vmatpush3.bf16.msra.mxu1 %v3713_v28 }
 0x491   :  { %2676 = vmatprep.subr.bf16.mxu0 %v3172_v0  ;;  %2696 = vmatprep.subr.bf16.mxu1 %v3172_v0 }
 0x494   :  { %2677 = vmatpush3.bf16.msra.mxu0 %v3718_v29  ;;  %2697 = vmatpush3.bf16.msra.mxu1 %v3721_v30 }
 0x495   :  { %2678 = vmatprep.subr.bf16.mxu0 %v3172_v0  ;;  %2698 = vmatprep.subr.bf16.mxu1 %v3172_v0 }
 0x498   :  { %2679 = vmatpush3.bf16.msra.mxu0 %v3726_v31  ;;  %2699 = vmatpush3.bf16.msra.mxu1 %v3729_v32 }
 0x499   :  { %2704 = vmatprep.subr.bf16.mxu0 %v3172_v0  ;;  %2724 = vmatprep.subr.bf16.mxu1 %v3172_v0 }
 0x51b   :  { %v1138_v33 = vpop.f32.mrf.mxu0  ;;  %v1187_v38 = vpop.f32.mrf.mxu1 }
 0x51c   :  { %v1193_v48 = vadd.f32 %v1187_v38, %v1152_v46  ;;  %v1144_v49 = vadd.f32 %v1138_v33, %v1103_v47  ;;  %v3768_v46 = vld [vmem:[#allocation7 + $0x48] ss:$16 sps:$4 sm:$0xff]   ;;  %v3771_v47 = vld [vmem:[#allocation7 + $0x4c] ss:$16 sps:$4 sm:$0xff]  }
 0x51d   :  { %v2602_v39 = vpop.f32.mrf.mxu0  ;;  %v2622_v40 = vpop.f32.mrf.mxu1 }
 0x51e   :  { %v1194_v50 = vmul.f32 0.5, %v1193_v48  ;;  %v1145_v51 = vmul.f32 0.5, %v1144_v49  ;;  %v3776_v48 = vld [vmem:[#allocation7 + $0x28] ss:$16 sps:$4 sm:$0xff]   ;;  %v3779_v49 = vld [vmem:[#allocation7 + $0x2c] ss:$16 sps:$4 sm:$0xff]  }
 0x51f   :  { %v1141_v41 = vpop.f32.mrf.mxu0  ;;  %v1190_v42 = vpop.f32.mrf.mxu1 }
 0x520   :  { %2988 = vtanh.f32 %v1194_v50  ;;  %v3784_v50 = vld [vmem:[#allocation7 + $0x8] ss:$16 sps:$4 sm:$0xff]  }
 0x521   :  { %v2603_v44 = vpop.f32.mrf.mxu0  ;;  %v2623_v16 = vpop.f32.mrf.mxu1  ;;  %2990 = vtanh.f32 %v1145_v51  ;;  %v3787_v51 = vld [vmem:[#allocation7 + $0xc] ss:$16 sps:$4 sm:$0xff]  }
 0x522   :  { %v3760_v16 = vld [vmem:[#allocation7 + $0x68] ss:$16 sps:$4 sm:$0xff]  }
 0x52d   :  { %v2989_v34 = vpop.eup %2988 }
 0x52e   :  { %v2991_v2 = vpop.eup %2990  ;;  %v1196_v4 = vmul.f32 0.5, %v2989_v34 }
 0x52f   :  { %v1147_v7 = vmul.f32 0.5, %v2991_v2 }
 0x530   :  { %v1197_v8 = vadd.f32 0.5, %v1196_v4  ;;  %v1300_v4 = vld [vmem:[#allocation4 + $0x58] sm:$0xff] }
 0x531   :  { %v1148_v43 = vadd.f32 0.5, %v1147_v7  ;;  %v1440_v7 = vrot.slane %v1300_v4, 4 }
 0x532   :  { %v1290_v10 = vmul.f32 %v1197_v8, %v3629_v5  ;;  %v3755_v5 = vld [vmem:[#allocation7 + $0x8c] ss:$16 sps:$4 sm:$0xff]  }
 0x53b   :  { %v1233_v55 = vpop.f32.mrf.mxu0  ;;  %v1279_v56 = vpop.f32.mrf.mxu1 }
 0x53c   :  { %v1239_v57 = vadd.f32 %v1233_v55, %v1198_v53  ;;  %v1285_v19 = vadd.f32 %v1279_v56, %v1244_v58  ;;  %v1299_v58 = vld [vmem:[#allocation4 + $0x50] sm:$0xff] }
 0x53d   :  { %v2642_v59 = vpop.f32.mrf.mxu0  ;;  %v2662_v61 = vpop.f32.mrf.mxu1 }
 0x53e   :  { %2992 = vtanh.f32 %v1239_v57  ;;  %v1286_v6 = vmul.f32 0.5, %v1285_v19  ;;  %v1301_v19 = vunpack.c.l.bf16 %v1299_v58 }
 0x53f   :  { %v1236_v62 = vpop.f32.mrf.mxu0  ;;  %v1282_v63 = vpop.f32.mrf.mxu1 }
 0x540   :  { %2994 = vtanh.f32 %v1286_v6  ;;  %v1348_v62 = vrot.slane %v1299_v58, 4  ;;  %v1396_v6 = vunpack.c.l.bf16 %v1300_v4 }
 0x541   :  { %v2643_v35 = vpop.f32.mrf.mxu0  ;;  %v2663_v1 = vpop.f32.mrf.mxu1 }
 0x542   :  { %v1350_v63 = vunpack.c.l.bf16 %v1348_v62 }
 0x54b   :  { %v2993_v9 = vpop.eup %2992 }
 0x54c   :  { %v1291_v33 = vmul.f32 %v2993_v9, %v1148_v43 }
 0x54d   :  { %v2995_v39 = vpop.eup %2994 }
 0x54e   :  { %v3735_v38 = vadd.f32 %v1291_v33, %v1290_v10  ;;  %v1288_v40 = vmul.f32 0.5, %v2995_v39  ;;  %v1442_v10 = vunpack.c.l.bf16 %v1440_v7 }
 0x550   :  { %2996 = vtanh.f32 %v3735_v38  ;;  %v1289_v41 = vadd.f32 0.5, %v1288_v40 }
 0x55d   :  { %v2997_v42 = vpop.eup %2996 }
 0x55e   :  { %v1294_v15 = vmul.f32 %v2997_v42, %v1289_v41 }
 0x560   :  { %v1295_v44 = vpack.c.bf16 %v1294_v15, %v1294_v15 }
 0x562   :  { %1297 = vst [vmem:[#allocation9 + $0x10] sm:$0xf] %v1295_v44  ;;  %2681 = vmatmul.mubr.bf16.vlgmr.msra.gmra.mxu0 %v1295_v44  ;;  %2701 = vmatmul.mubr.bf16.vlgmr.msra.gmra.mxu1 %v1295_v44 }
 0x563   :  { %2705 = vmatpush3.bf16.msra.mxu0 %v3632_v11  ;;  %2725 = vmatpush3.bf16.msra.mxu1 %v3635_v12 }
 0x564   :  { %2706 = vmatprep.subr.bf16.mxu0 %v3172_v0  ;;  %2726 = vmatprep.subr.bf16.mxu1 %v3172_v0 }
 0x565   :  { %2720 = vmatprep.mubr.msk.bf16.mxu0 %vm3173_vm0, %v3172_v0  ;;  %2740 = vmatprep.mubr.msk.bf16.mxu1 %vm3173_vm0, %v3172_v0 }
 0x567   :  { %2707 = vmatpush3.bf16.msra.mxu0 %v3644_v3  ;;  %2727 = vmatpush3.bf16.msra.mxu1 %v3647_v36 }
 0x568   :  { %2708 = vmatprep.subr.bf16.mxu0 %v3172_v0  ;;  %2728 = vmatprep.subr.bf16.mxu1 %v3172_v0 }
 0x56b   :  { %2709 = vmatpush3.bf16.msra.mxu0 %v3652_v13  ;;  %2729 = vmatpush3.bf16.msra.mxu1 %v3655_v37 }
 0x56c   :  { %2710 = vmatprep.subr.bf16.mxu0 %v3172_v0  ;;  %2730 = vmatprep.subr.bf16.mxu1 %v3172_v0 }
 0x56f   :  { %2711 = vmatpush3.bf16.msra.mxu0 %v3660_v14  ;;  %2731 = vmatpush3.bf16.msra.mxu1 %v3755_v5 }
 0x570   :  { %2712 = vmatprep.subr.bf16.mxu0 %v3172_v0  ;;  %2732 = vmatprep.subr.bf16.mxu1 %v3172_v0 }
 0x573   :  { %2713 = vmatpush3.bf16.msra.mxu0 %v3760_v16  ;;  %2733 = vmatpush3.bf16.msra.mxu1 %v3763_v45 }
 0x574   :  { %2714 = vmatprep.subr.bf16.mxu0 %v3172_v0  ;;  %2734 = vmatprep.subr.bf16.mxu1 %v3172_v0 }
 0x577   :  { %2715 = vmatpush3.bf16.msra.mxu0 %v3768_v46  ;;  %2735 = vmatpush3.bf16.msra.mxu1 %v3771_v47 }
 0x578   :  { %2716 = vmatprep.subr.bf16.mxu0 %v3172_v0  ;;  %2736 = vmatprep.subr.bf16.mxu1 %v3172_v0 }
 0x57b   :  { %2717 = vmatpush3.bf16.msra.mxu0 %v3776_v48  ;;  %2737 = vmatpush3.bf16.msra.mxu1 %v3779_v49 }
 0x57c   :  { %2718 = vmatprep.subr.bf16.mxu0 %v3172_v0  ;;  %2738 = vmatprep.subr.bf16.mxu1 %v3172_v0 }
 0x57f   :  { %2719 = vmatpush3.bf16.msra.mxu0 %v3784_v50  ;;  %2739 = vmatpush3.bf16.msra.mxu1 %v3787_v51 }
 0x580   :  { %2744 = vmatprep.subr.bf16.mxu0 %v3172_v0  ;;  %2764 = vmatprep.subr.bf16.mxu1 %v3172_v0 }
 0x582   :  { %2721 = vmatmul.mubr.bf16.vlgmr.msra.gmra.mxu0 %v1295_v44  ;;  %2741 = vmatmul.mubr.bf16.vlgmr.msra.gmra.mxu1 %v1295_v44 }
 0x583   :  { %2745 = vmatpush3.bf16.msra.mxu0 %v3576_v17  ;;  %2765 = vmatpush3.bf16.msra.mxu1 %v3579_v18 }
 0x584   :  { %2746 = vmatprep.subr.bf16.mxu0 %v3172_v0  ;;  %2766 = vmatprep.subr.bf16.mxu1 %v3172_v0 }
 0x585   :  { %2760 = vmatprep.mubr.msk.bf16.mxu0 %vm3173_vm0, %v3172_v0  ;;  %2780 = vmatprep.mubr.msk.bf16.mxu1 %vm3173_vm0, %v3172_v0 }
 0x587   :  { %2747 = vmatpush3.bf16.msra.mxu0 %v3588_v20  ;;  %2767 = vmatpush3.bf16.msra.mxu1 %v3591_v21 }
 0x588   :  { %2748 = vmatprep.subr.bf16.mxu0 %v3172_v0  ;;  %2768 = vmatprep.subr.bf16.mxu1 %v3172_v0 }
 0x58b   :  { %2749 = vmatpush3.bf16.msra.mxu0 %v3596_v22  ;;  %2769 = vmatpush3.bf16.msra.mxu1 %v3599_v23 }
 0x58c   :  { %2750 = vmatprep.subr.bf16.mxu0 %v3172_v0  ;;  %2770 = vmatprep.subr.bf16.mxu1 %v3172_v0 }
 0x58f   :  { %2751 = vmatpush3.bf16.msra.mxu0 %v3604_v24  ;;  %2771 = vmatpush3.bf16.msra.mxu1 %v3607_v60 }
 0x590   :  { %2752 = vmatprep.subr.bf16.mxu0 %v3172_v0  ;;  %2772 = vmatprep.subr.bf16.mxu1 %v3172_v0 }
 0x593   :  { %2753 = vmatpush3.bf16.msra.mxu0 %v3702_v25  ;;  %2773 = vmatpush3.bf16.msra.mxu1 %v3705_v26 }
 0x594   :  { %2754 = vmatprep.subr.bf16.mxu0 %v3172_v0  ;;  %2774 = vmatprep.subr.bf16.mxu1 %v3172_v0 }
 0x597   :  { %2755 = vmatpush3.bf16.msra.mxu0 %v3710_v27  ;;  %2775 = vmatpush3.bf16.msra.mxu1 %v3713_v28 }
 0x598   :  { %2756 = vmatprep.subr.bf16.mxu0 %v3172_v0  ;;  %2776 = vmatprep.subr.bf16.mxu1 %v3172_v0 }
 0x59b   :  { %2757 = vmatpush3.bf16.msra.mxu0 %v3718_v29  ;;  %2777 = vmatpush3.bf16.msra.mxu1 %v3721_v30 }
 0x59c   :  { %2758 = vmatprep.subr.bf16.mxu0 %v3172_v0  ;;  %2778 = vmatprep.subr.bf16.mxu1 %v3172_v0 }
 0x59f   :  { %2759 = vmatpush3.bf16.msra.mxu0 %v3726_v31  ;;  %2779 = vmatpush3.bf16.msra.mxu1 %v3729_v32 }
 0x5a0   :  { %2784 = vmatprep.subr.bf16.mxu0 %v3172_v0  ;;  %2804 = vmatprep.subr.bf16.mxu1 %v3172_v0 }
 0x622   :  { %v1336_v52 = vpop.f32.mrf.mxu0  ;;  %v1385_v53 = vpop.f32.mrf.mxu1 }
 0x623   :  { %v1391_v34 = vadd.f32 %v1385_v53, %v1350_v63  ;;  %v1342_v35 = vadd.f32 %v1336_v52, %v1301_v19 }
 0x624   :  { %v2682_v54 = vpop.f32.mrf.mxu0  ;;  %v2702_v55 = vpop.f32.mrf.mxu1 }
 0x625   :  { %v1392_v1 = vmul.f32 0.5, %v1391_v34  ;;  %v1343_v2 = vmul.f32 0.5, %v1342_v35 }
 0x626   :  { %v1339_v56 = vpop.f32.mrf.mxu0  ;;  %v1388_v57 = vpop.f32.mrf.mxu1 }
 0x627   :  { %2998 = vtanh.f32 %v1392_v1 }
 0x628   :  { %v2683_v59 = vpop.f32.mrf.mxu0  ;;  %v2703_v61 = vpop.f32.mrf.mxu1  ;;  %3000 = vtanh.f32 %v1343_v2 }
 0x634   :  { %v2999_v15 = vpop.eup %2998 }
 0x635   :  { %v3001_v53 = vpop.eup %3000  ;;  %v1394_v54 = vmul.f32 0.5, %v2999_v15 }
 0x636   :  { %v1345_v56 = vmul.f32 0.5, %v3001_v53 }
 0x637   :  { %v1395_v57 = vadd.f32 0.5, %v1394_v54 }
 0x638   :  { %v1346_v58 = vadd.f32 0.5, %v1345_v56 }
 0x639   :  { %v1488_v61 = vmul.f32 %v1395_v57, %v3735_v38  ;;  %v1498_v38 = vld [vmem:[#allocation4 + $0x68] sm:$0xff] }
 0x63a   :  { %v1638_v7 = vrot.slane %v1498_v38, 4 }
 0x642   :  { %v1431_v8 = vpop.f32.mrf.mxu0  ;;  %v1477_v43 = vpop.f32.mrf.mxu1 }
 0x643   :  { %v1437_v9 = vadd.f32 %v1431_v8, %v1396_v6  ;;  %v1483_v42 = vadd.f32 %v1477_v43, %v1442_v10  ;;  %v1594_v6 = vunpack.c.l.bf16 %v1498_v38  ;;  %v1640_v10 = vunpack.c.l.bf16 %v1638_v7 }
 0x644   :  { %v2722_v33 = vpop.f32.mrf.mxu0  ;;  %v2742_v39 = vpop.f32.mrf.mxu1 }
 0x645   :  { %3002 = vtanh.f32 %v1437_v9  ;;  %v1484_v55 = vmul.f32 0.5, %v1483_v42 }
 0x646   :  { %v1434_v40 = vpop.f32.mrf.mxu0  ;;  %v1480_v41 = vpop.f32.mrf.mxu1 }
 0x647   :  { %3004 = vtanh.f32 %v1484_v55 }
 0x648   :  { %v2723_v44 = vpop.f32.mrf.mxu0  ;;  %v2743_v52 = vpop.f32.mrf.mxu1 }
 0x652   :  { %v3003_v59 = vpop.eup %3002 }
 0x653   :  { %v1489_v62 = vmul.f32 %v3003_v59, %v1346_v58 }
 0x654   :  { %v3005_v19 = vpop.eup %3004 }
 0x655   :  { %v3829_v63 = vadd.f32 %v1489_v62, %v1488_v61  ;;  %v1486_v34 = vmul.f32 0.5, %v3005_v19 }
 0x657   :  { %3006 = vtanh.f32 %v3829_v63  ;;  %v1487_v35 = vadd.f32 0.5, %v1486_v34 }
 0x664   :  { %v3007_v1 = vpop.eup %3006 }
 0x665   :  { %v1492_v2 = vmul.f32 %v3007_v1, %v1487_v35 }
 0x667   :  { %v1493_v4 = vpack.c.bf16 %v1492_v2, %v1492_v2 }
 0x669   :  { %1495 = vst [vmem:[#allocation9 + $0x14] sm:$0xf] %v1493_v4  ;;  %2761 = vmatmul.mubr.bf16.vlgmr.msra.gmra.mxu0 %v1493_v4  ;;  %2781 = vmatmul.mubr.bf16.vlgmr.msra.gmra.mxu1 %v1493_v4 }
 0x66a   :  { %2785 = vmatpush3.bf16.msra.mxu0 %v3632_v11  ;;  %2805 = vmatpush3.bf16.msra.mxu1 %v3635_v12 }
 0x66b   :  { %2786 = vmatprep.subr.bf16.mxu0 %v3172_v0  ;;  %2806 = vmatprep.subr.bf16.mxu1 %v3172_v0 }
 0x66c   :  { %2800 = vmatprep.mubr.msk.bf16.mxu0 %vm3173_vm0, %v3172_v0  ;;  %2820 = vmatprep.mubr.msk.bf16.mxu1 %vm3173_vm0, %v3172_v0 }
 0x66e   :  { %2787 = vmatpush3.bf16.msra.mxu0 %v3644_v3  ;;  %2807 = vmatpush3.bf16.msra.mxu1 %v3647_v36 }
 0x66f   :  { %2788 = vmatprep.subr.bf16.mxu0 %v3172_v0  ;;  %2808 = vmatprep.subr.bf16.mxu1 %v3172_v0 }
 0x672   :  { %2789 = vmatpush3.bf16.msra.mxu0 %v3652_v13  ;;  %2809 = vmatpush3.bf16.msra.mxu1 %v3655_v37 }
 0x673   :  { %2790 = vmatprep.subr.bf16.mxu0 %v3172_v0  ;;  %2810 = vmatprep.subr.bf16.mxu1 %v3172_v0 }
 0x676   :  { %2791 = vmatpush3.bf16.msra.mxu0 %v3660_v14  ;;  %2811 = vmatpush3.bf16.msra.mxu1 %v3755_v5 }
 0x677   :  { %2792 = vmatprep.subr.bf16.mxu0 %v3172_v0  ;;  %2812 = vmatprep.subr.bf16.mxu1 %v3172_v0 }
 0x67a   :  { %2793 = vmatpush3.bf16.msra.mxu0 %v3760_v16  ;;  %2813 = vmatpush3.bf16.msra.mxu1 %v3763_v45 }
 0x67b   :  { %2794 = vmatprep.subr.bf16.mxu0 %v3172_v0  ;;  %2814 = vmatprep.subr.bf16.mxu1 %v3172_v0 }
 0x67e   :  { %2795 = vmatpush3.bf16.msra.mxu0 %v3768_v46  ;;  %2815 = vmatpush3.bf16.msra.mxu1 %v3771_v47 }
 0x67f   :  { %2796 = vmatprep.subr.bf16.mxu0 %v3172_v0  ;;  %2816 = vmatprep.subr.bf16.mxu1 %v3172_v0 }
 0x682   :  { %2797 = vmatpush3.bf16.msra.mxu0 %v3776_v48  ;;  %2817 = vmatpush3.bf16.msra.mxu1 %v3779_v49 }
 0x683   :  { %2798 = vmatprep.subr.bf16.mxu0 %v3172_v0  ;;  %2818 = vmatprep.subr.bf16.mxu1 %v3172_v0 }
 0x686   :  { %2799 = vmatpush3.bf16.msra.mxu0 %v3784_v50  ;;  %2819 = vmatpush3.bf16.msra.mxu1 %v3787_v51 }
 0x687   :  { %2824 = vmatprep.subr.bf16.mxu0 %v3172_v0  ;;  %2844 = vmatprep.subr.bf16.mxu1 %v3172_v0 }
 0x689   :  { %2801 = vmatmul.mubr.bf16.vlgmr.msra.gmra.mxu0 %v1493_v4  ;;  %2821 = vmatmul.mubr.bf16.vlgmr.msra.gmra.mxu1 %v1493_v4 }
 0x68a   :  { %2825 = vmatpush3.bf16.msra.mxu0 %v3576_v17  ;;  %2845 = vmatpush3.bf16.msra.mxu1 %v3579_v18 }
 0x68b   :  { %2826 = vmatprep.subr.bf16.mxu0 %v3172_v0  ;;  %2846 = vmatprep.subr.bf16.mxu1 %v3172_v0 }
 0x68c   :  { %2840 = vmatprep.mubr.msk.bf16.mxu0 %vm3173_vm0, %v3172_v0  ;;  %2860 = vmatprep.mubr.msk.bf16.mxu1 %vm3173_vm0, %v3172_v0 }
 0x68e   :  { %2827 = vmatpush3.bf16.msra.mxu0 %v3588_v20  ;;  %2847 = vmatpush3.bf16.msra.mxu1 %v3591_v21 }
 0x68f   :  { %2828 = vmatprep.subr.bf16.mxu0 %v3172_v0  ;;  %2848 = vmatprep.subr.bf16.mxu1 %v3172_v0 }
 0x692   :  { %2829 = vmatpush3.bf16.msra.mxu0 %v3596_v22  ;;  %2849 = vmatpush3.bf16.msra.mxu1 %v3599_v23 }
 0x693   :  { %2830 = vmatprep.subr.bf16.mxu0 %v3172_v0  ;;  %2850 = vmatprep.subr.bf16.mxu1 %v3172_v0 }
 0x696   :  { %2831 = vmatpush3.bf16.msra.mxu0 %v3604_v24  ;;  %2851 = vmatpush3.bf16.msra.mxu1 %v3607_v60  ;;  %v1497_v24 = vld [vmem:[#allocation4 + $0x60] sm:$0xff] }
 0x697   :  { %2832 = vmatprep.subr.bf16.mxu0 %v3172_v0  ;;  %2852 = vmatprep.subr.bf16.mxu1 %v3172_v0 }
 0x69a   :  { %2833 = vmatpush3.bf16.msra.mxu0 %v3702_v25  ;;  %2853 = vmatpush3.bf16.msra.mxu1 %v3705_v26  ;;  %v1546_v26 = vrot.slane %v1497_v24, 4 }
 0x69b   :  { %2834 = vmatprep.subr.bf16.mxu0 %v3172_v0  ;;  %2854 = vmatprep.subr.bf16.mxu1 %v3172_v0 }
 0x69e   :  { %2835 = vmatpush3.bf16.msra.mxu0 %v3710_v27  ;;  %2855 = vmatpush3.bf16.msra.mxu1 %v3713_v28  ;;  %v1548_v27 = vunpack.c.l.bf16 %v1546_v26  ;;  %v1499_v28 = vunpack.c.l.bf16 %v1497_v24 }
 0x69f   :  { %2836 = vmatprep.subr.bf16.mxu0 %v3172_v0  ;;  %2856 = vmatprep.subr.bf16.mxu1 %v3172_v0 }
 0x6a2   :  { %2837 = vmatpush3.bf16.msra.mxu0 %v3718_v29  ;;  %2857 = vmatpush3.bf16.msra.mxu1 %v3721_v30 }
 0x6a3   :  { %2838 = vmatprep.subr.bf16.mxu0 %v3172_v0  ;;  %2858 = vmatprep.subr.bf16.mxu1 %v3172_v0 }
 0x6a6   :  { %2839 = vmatpush3.bf16.msra.mxu0 %v3726_v31  ;;  %2859 = vmatpush3.bf16.msra.mxu1 %v3729_v32 }
 0x6a7   :  { %2864 = vmatprep.subr.bf16.mxu0 %v3172_v0  ;;  %2884 = vmatprep.subr.bf16.mxu1 %v3172_v0 }
 0x729   :  { %v1534_v17 = vpop.f32.mrf.mxu0  ;;  %v1583_v18 = vpop.f32.mrf.mxu1 }
 0x72a   :  { %v1589_v29 = vadd.f32 %v1583_v18, %v1548_v27  ;;  %v1540_v30 = vadd.f32 %v1534_v17, %v1499_v28 }
 0x72b   :  { %v2762_v20 = vpop.f32.mrf.mxu0  ;;  %v2782_v21 = vpop.f32.mrf.mxu1 }
 0x72c   :  { %v1590_v31 = vmul.f32 0.5, %v1589_v29  ;;  %v1541_v32 = vmul.f32 0.5, %v1540_v30 }
 0x72d   :  { %v1537_v22 = vpop.f32.mrf.mxu0  ;;  %v1586_v23 = vpop.f32.mrf.mxu1 }
 0x72e   :  { %3008 = vtanh.f32 %v1590_v31 }
 0x72f   :  { %v2763_v60 = vpop.f32.mrf.mxu0  ;;  %v2783_v25 = vpop.f32.mrf.mxu1  ;;  %3010 = vtanh.f32 %v1541_v32 }
 0x73b   :  { %v3009_v15 = vpop.eup %3008 }
 0x73c   :  { %v3011_v53 = vpop.eup %3010  ;;  %v1592_v54 = vmul.f32 0.5, %v3009_v15 }
 0x73d   :  { %v1543_v56 = vmul.f32 0.5, %v3011_v53 }
 0x73e   :  { %v1593_v57 = vadd.f32 0.5, %v1592_v54 }
 0x73f   :  { %v1544_v58 = vadd.f32 0.5, %v1543_v56 }
 0x740   :  { %v1686_v61 = vmul.f32 %v1593_v57, %v3829_v63 }
 0x749   :  { %v1629_v8 = vpop.f32.mrf.mxu0  ;;  %v1675_v43 = vpop.f32.mrf.mxu1 }
 0x74a   :  { %v1635_v9 = vadd.f32 %v1629_v8, %v1594_v6  ;;  %v1681_v42 = vadd.f32 %v1675_v43, %v1640_v10 }
 0x74b   :  { %v2802_v33 = vpop.f32.mrf.mxu0  ;;  %v2822_v39 = vpop.f32.mrf.mxu1 }
 0x74c   :  { %3012 = vtanh.f32 %v1635_v9  ;;  %v1682_v55 = vmul.f32 0.5, %v1681_v42 }
 0x74d   :  { %v1632_v40 = vpop.f32.mrf.mxu0  ;;  %v1678_v41 = vpop.f32.mrf.mxu1 }
 0x74e   :  { %3014 = vtanh.f32 %v1682_v55 }
 0x74f   :  { %v2803_v44 = vpop.f32.mrf.mxu0  ;;  %v2823_v52 = vpop.f32.mrf.mxu1 }
 0x759   :  { %v3013_v59 = vpop.eup %3012 }
 0x75a   :  { %v1687_v62 = vmul.f32 %v3013_v59, %v1544_v58 }
 0x75b   :  { %v3015_v34 = vpop.eup %3014 }
 0x75c   :  { %v3905_v19 = vadd.f32 %v1687_v62, %v1686_v61  ;;  %v1684_v35 = vmul.f32 0.5, %v3015_v34 }
 0x75e   :  { %3016 = vtanh.f32 %v3905_v19  ;;  %v1685_v1 = vadd.f32 0.5, %v1684_v35 }
 0x76b   :  { %v3017_v2 = vpop.eup %3016 }
 0x76c   :  { %v1690_v4 = vmul.f32 %v3017_v2, %v1685_v1 }
 0x76e   :  { %v1691_v17 = vpack.c.bf16 %v1690_v4, %v1690_v4 }
 0x770   :  { %1693 = vst [vmem:[#allocation9 + $0x18] sm:$0xf] %v1691_v17  ;;  %2841 = vmatmul.mubr.bf16.vlgmr.msra.gmra.mxu0 %v1691_v17  ;;  %2861 = vmatmul.mubr.bf16.vlgmr.msra.gmra.mxu1 %v1691_v17 }
 0x771   :  { %2865 = vmatpush3.bf16.msra.mxu0 %v3632_v11  ;;  %2885 = vmatpush3.bf16.msra.mxu1 %v3635_v12 }
 0x772   :  { %2866 = vmatprep.subr.bf16.mxu0 %v3172_v0  ;;  %2886 = vmatprep.subr.bf16.mxu1 %v3172_v0 }
 0x773   :  { %2880 = vmatprep.mubr.msk.bf16.mxu0 %vm3173_vm0, %v3172_v0  ;;  %2900 = vmatprep.mubr.msk.bf16.mxu1 %vm3173_vm0, %v3172_v0 }
 0x775   :  { %2867 = vmatpush3.bf16.msra.mxu0 %v3644_v3  ;;  %2887 = vmatpush3.bf16.msra.mxu1 %v3647_v36 }
 0x776   :  { %2868 = vmatprep.subr.bf16.mxu0 %v3172_v0  ;;  %2888 = vmatprep.subr.bf16.mxu1 %v3172_v0 }
 0x779   :  { %2869 = vmatpush3.bf16.msra.mxu0 %v3652_v13  ;;  %2889 = vmatpush3.bf16.msra.mxu1 %v3655_v37 }
 0x77a   :  { %2870 = vmatprep.subr.bf16.mxu0 %v3172_v0  ;;  %2890 = vmatprep.subr.bf16.mxu1 %v3172_v0 }
 0x77d   :  { %2871 = vmatpush3.bf16.msra.mxu0 %v3660_v14  ;;  %2891 = vmatpush3.bf16.msra.mxu1 %v3755_v5  ;;  %v1695_v14 = vld [vmem:[#allocation4 + $0x70] sm:$0xff] }
 0x77e   :  { %2872 = vmatprep.subr.bf16.mxu0 %v3172_v0  ;;  %2892 = vmatprep.subr.bf16.mxu1 %v3172_v0 }
 0x781   :  { %2873 = vmatpush3.bf16.msra.mxu0 %v3760_v16  ;;  %2893 = vmatpush3.bf16.msra.mxu1 %v3763_v45  ;;  %v1744_v45 = vrot.slane %v1695_v14, 4 }
 0x782   :  { %2874 = vmatprep.subr.bf16.mxu0 %v3172_v0  ;;  %2894 = vmatprep.subr.bf16.mxu1 %v3172_v0 }
 0x785   :  { %2875 = vmatpush3.bf16.msra.mxu0 %v3768_v46  ;;  %2895 = vmatpush3.bf16.msra.mxu1 %v3771_v47  ;;  %v1746_v46 = vunpack.c.l.bf16 %v1744_v45  ;;  %v1697_v47 = vunpack.c.l.bf16 %v1695_v14 }
 0x786   :  { %2876 = vmatprep.subr.bf16.mxu0 %v3172_v0  ;;  %2896 = vmatprep.subr.bf16.mxu1 %v3172_v0 }
 0x789   :  { %2877 = vmatpush3.bf16.msra.mxu0 %v3776_v48  ;;  %2897 = vmatpush3.bf16.msra.mxu1 %v3779_v49 }
 0x78a   :  { %2878 = vmatprep.subr.bf16.mxu0 %v3172_v0  ;;  %2898 = vmatprep.subr.bf16.mxu1 %v3172_v0 }
 0x78d   :  { %2879 = vmatpush3.bf16.msra.mxu0 %v3784_v50  ;;  %2899 = vmatpush3.bf16.msra.mxu1 %v3787_v51  ;;  %v1696_v51 = vld [vmem:[#allocation4 + $0x78] sm:$0xff] }
 0x78e   :  { %v1792_v63 = vunpack.c.l.bf16 %v1696_v51  ;;  %v1836_v18 = vrot.slane %v1696_v51, 4 }
 0x790   :  { %2881 = vmatmul.mubr.bf16.vlgmr.msra.gmra.mxu0 %v1691_v17  ;;  %2901 = vmatmul.mubr.bf16.vlgmr.msra.gmra.mxu1 %v1691_v17  ;;  %v1838_v23 = vunpack.c.l.bf16 %v1836_v18 }
 0x830   :  { %v1732_v11 = vpop.f32.mrf.mxu0  ;;  %v1781_v12 = vpop.f32.mrf.mxu1 }
 0x831   :  { %v1787_v48 = vadd.f32 %v1781_v12, %v1746_v46  ;;  %v1738_v0 = vadd.f32 %v1732_v11, %v1697_v47 }
 0x832   :  { %v2842_v3 = vpop.f32.mrf.mxu0  ;;  %v2862_v36 = vpop.f32.mrf.mxu1 }
 0x833   :  { %v1788_v49 = vmul.f32 0.5, %v1787_v48  ;;  %v1739_v50 = vmul.f32 0.5, %v1738_v0 }
 0x834   :  { %v1735_v13 = vpop.f32.mrf.mxu0  ;;  %v1784_v37 = vpop.f32.mrf.mxu1 }
 0x835   :  { %3018 = vtanh.f32 %v1788_v49 }
 0x836   :  { %v2843_v5 = vpop.f32.mrf.mxu0  ;;  %v2863_v16 = vpop.f32.mrf.mxu1  ;;  %3020 = vtanh.f32 %v1739_v50 }
 0x842   :  { %v3019_v28 = vpop.eup %3018 }
 0x843   :  { %v3021_v31 = vpop.eup %3020  ;;  %v1790_v32 = vmul.f32 0.5, %v3019_v28 }
 0x844   :  { %v1741_v6 = vmul.f32 0.5, %v3021_v31 }
 0x845   :  { %v1791_v7 = vadd.f32 0.5, %v1790_v32 }
 0x846   :  { %v1742_v8 = vadd.f32 0.5, %v1741_v6 }
 0x847   :  { %v1884_v9 = vmul.f32 %v1791_v7, %v3905_v19 }
 0x850   :  { %v1827_v20 = vpop.f32.mrf.mxu0  ;;  %v1873_v21 = vpop.f32.mrf.mxu1 }
 0x851   :  { %v1833_v22 = vadd.f32 %v1827_v20, %v1792_v63  ;;  %v1879_v27 = vadd.f32 %v1873_v21, %v1838_v23 }
 0x852   :  { %v2882_v24 = vpop.f32.mrf.mxu0  ;;  %v2902_v60 = vpop.f32.mrf.mxu1 }
 0x853   :  { %3022 = vtanh.f32 %v1833_v22  ;;  %v1880_v38 = vmul.f32 0.5, %v1879_v27 }
 0x854   :  { %v1830_v25 = vpop.f32.mrf.mxu0  ;;  %v1876_v26 = vpop.f32.mrf.mxu1 }
 0x855   :  { %3024 = vtanh.f32 %v1880_v38 }
 0x856   :  { %v2883_v29 = vpop.f32.mrf.mxu0  ;;  %v2903_v30 = vpop.f32.mrf.mxu1 }
 0x860   :  { %v3023_v43 = vpop.eup %3022 }
 0x861   :  { %v1885_v10 = vmul.f32 %v3023_v43, %v1742_v8 }
 0x862   :  { %v3025_v39 = vpop.eup %3024 }
 0x863   :  { %v1886_v33 = vadd.f32 %v1885_v10, %v1884_v9  ;;  %v1882_v40 = vmul.f32 0.5, %v3025_v39 }
 0x865   :  { %1898 = vst [vmem:[#allocation12] sm:$0xff] %v1886_v33  ;;  %3026 = vtanh.f32 %v1886_v33  ;;  %v1883_v41 = vadd.f32 0.5, %v1882_v40 }
 0x872   :  { %v3027_v42 = vpop.eup %3026 }
 0x873   :  { %v1888_v15 = vmul.f32 %v3027_v42, %v1883_v41 }
 0x875   :  { %v1889_v44 = vpack.c.bf16 %v1888_v15, %v1888_v15  ;;  %1897 = vst [vmem:[#allocation10] sm:$0xff] %v1888_v15 }
 0x876   :  { %3111 = shalt.err (!%p3108_p0)
}
 0x877   :  { %1920 = dma.vmem_to_hbm [thread:$0]  %s1918_s1, 128, %s3962_s3, [#allocation11]   ;;  %1891 = vst [vmem:[#allocation9 + $0x1c] sm:$0xf] %v1889_v44 }
 0x878   :  { %s3120_s8 = scalar_lea.vmem %s1928_s30, 128  ;;  %p3125_p2 = scmp.lt.s32.totalorder %s1928_s30, %s1928_s30 }
 0x879   :  { %p3121_p1 = scmp.ne.s32.totalorder %s1928_s30, %s3120_s8  ;;  %p3126_p3 = scmp.lt.s32.totalorder %s3120_s8, %s3120_s8 }
 0x87b   :  { %p3127_p4 = por %p3126_p3, %p3125_p2 }
 0x87d   :  { %p3128_p5 = pnand %p3127_p4, %p3121_p1 }
 0x87f   :  { %3131 = shalt.err (!%p3128_p5)
}
 0x880   :  { %1930 = dma.vmem_to_hbm [thread:$0]  %s1928_s30, 128, %s3963_s4, [#allocation11]  }
 0x881   :  { %s3140_s11 = scalar_lea.vmem %s3943_s28, 512  ;;  %p3145_p7 = scmp.lt.s32.totalorder %s3943_s28, %s3943_s28 }
 0x882   :  { %p3141_p6 = scmp.ne.s32.totalorder %s3943_s28, %s3140_s11  ;;  %p3146_p8 = scmp.lt.s32.totalorder %s3140_s11, %s3140_s11 }
 0x884   :  { %p3147_p9 = por %p3146_p8, %p3145_p7 }
 0x886   :  { %p3148_p10 = pnand %p3147_p9, %p3141_p6 }
 0x888   :  { %3151 = shalt.err (!%p3148_p10)
}
 0x889   :  { %s3178_s3 = smov 64   ;;  %s3179_s12 = smov 4  }
 0x88a   :  { %1910 = dma.vmem_to_hbm [thread:$0]  %s3943_s28, 512, %s3961_s2, [#allocation6], %s3178_s3, %s3178_s3, %s3179_s12  }
 0x88b   :  { %3164 = dma.done.wait [#allocation6], 512  }
 0x88c   :  { %3165 = vsyncadd [#allocation6], 4294966784 }
 0x88d   :  { %3166 = dma.done.wait [#allocation11], 256  }
 0x88e   :  { %3167 = vsyncadd [#allocation11], 4294967040 }
 0x88f   :  { %1940 = vsyncpa [#allocation5], 1 }
 0x890   :  { %1941 = vsyncpa [#allocation8], 1 }
 0x891   :  { %1942 = vsyncpa [#allocation6], 1 }
 0x892   :  { %1943 = vsyncpa [#allocation11], 1 }

</bundles_post_ra>
